<compile_context>
chip_gen: v7x
topology: tpu7x:2x2x1
jax: 0.10.0
libtpu: 0.0.40
codegen_flags: <defaults>
</compile_context>

<pallas_src>
import functools

import jax
import jax.numpy as jnp
from jax.experimental import pallas as pl
from jax.experimental.pallas import tpu as pltpu


def _joint_lm_kernel(x_ref,
                     wqkv_ref, bqkv_ref,
                     wo_ref, bo_ref,
                     ln1_g_ref, ln1_b_ref,
                     w1_ref, b1_ref, w2_ref, b2_ref,
                     ln2_g_ref, ln2_b_ref,
                     out_ref,
                     *, s1):
    m, h = x_ref.shape                       # m = TB * S1 rows, h = hidden dim
    tb = m // s1

    x = x_ref[...]                           # (m, h) f32 (residual path)
    x_bf = x.astype(jnp.bfloat16)

    # ---- fused QKV projection: one (m, h) x (h, 3h) matmul, f32 accumulation ----
    qkv = jnp.dot(x_bf, wqkv_ref[...],
                  preferred_element_type=jnp.float32) + bqkv_ref[...]
    scale = jnp.float32(1.0) / jnp.sqrt(jnp.float32(h))
    q = (qkv[:, :h] * scale).reshape(tb, s1, h).astype(jnp.bfloat16)
    k = qkv[:, h:2 * h].reshape(tb, s1, h).astype(jnp.bfloat16)
    v = qkv[:, 2 * h:].reshape(tb, s1, h).astype(jnp.bfloat16)

    # ---- per-example attention; contract last axes directly (no k.T) ----
    scores = jax.lax.dot_general(
        q, k, (((2,), (2,)), ((0,), (0,))),
        preferred_element_type=jnp.float32)                 # (tb, s1, s1) f32
    scores = scores - jnp.max(scores, axis=-1, keepdims=True)
    p = jnp.exp(scores)
    denom = jnp.sum(p, axis=-1, keepdims=True)
    p = p * pl.reciprocal(denom, approx=True)               # EUP reciprocal
    attn = jax.lax.dot_general(
        p.astype(jnp.bfloat16), v, (((2,), (1,)), ((0,), (0,))),
        preferred_element_type=jnp.float32)                 # (tb, s1, h)
    attn = attn.reshape(m, h)
    attn = jnp.dot(attn.astype(jnp.bfloat16), wo_ref[...],
                   preferred_element_type=jnp.float32) + bo_ref[...]

    # ---- residual + LayerNorm 1 (f32 statistics) ----
    h1 = x + attn
    mu = jnp.mean(h1, axis=-1, keepdims=True)
    var = jnp.mean((h1 - mu) ** 2, axis=-1, keepdims=True)
    h1 = (h1 - mu) * jax.lax.rsqrt(var + 1e-5) * ln1_g_ref[...] + ln1_b_ref[...]

    # ---- FFN ----
    f = jnp.dot(h1.astype(jnp.bfloat16), w1_ref[...],
                preferred_element_type=jnp.float32) + b1_ref[...]
    f = jax.nn.gelu(f)
    f = jnp.dot(f.astype(jnp.bfloat16), w2_ref[...],
                preferred_element_type=jnp.float32) + b2_ref[...]

    # ---- residual + LayerNorm 2 ----
    h2 = h1 + f
    mu2 = jnp.mean(h2, axis=-1, keepdims=True)
    var2 = jnp.mean((h2 - mu2) ** 2, axis=-1, keepdims=True)
    out = (h2 - mu2) * jax.lax.rsqrt(var2 + 1e-5) * ln2_g_ref[...] + ln2_b_ref[...]

    out_ref[...] = out.astype(out_ref.dtype)


def _choose_batch_tile(b, s1, target_rows=128):
    """Pick TB (examples per grid step): TB*S1 >= target when possible, keep
    >= 2 grid steps (v7x megacore), and keep block rows a multiple of 8."""
    divisors = [d for d in range(1, b + 1) if b % d == 0]
    valid = [d for d in divisors if (d * s1) % 8 == 0 or d == b]
    for d in valid:                                   # smallest tile hitting target
        if d * s1 >= target_rows and b // d >= 2:
            return d
    multi = [d for d in valid if b // d >= 2]
    if multi:
        return max(multi)                             # biggest tile, >= 2 steps
    return b


def joint_feature_extractor(num, cat, params):
    """num: (B, Sn, H) f32, cat: (B, Sc, H) f32 -> (B, Sn+Sc+1, H) f32."""
    B, Sn, H = num.shape
    Sc = cat.shape[1]
    S1 = Sn + Sc + 1
    F = params["w1"].shape[1]

    # --- torch.cat + Dropout(eval: identity) + AppendCLSToken, in the wrapper ---
    cls = jnp.broadcast_to(params["cls"][None].astype(jnp.float32), (B, 1, H))
    x = jnp.concatenate([num, cat, cls], axis=1).reshape(B * S1, H)

    # --- fuse QKV; cast matmul weights to bf16 (halves weight DMA bytes) ---
    bf16 = jnp.bfloat16
    wqkv = jnp.concatenate([params["wq"], params["wk"], params["wv"]],
                           axis=1).astype(bf16)                       # (H, 3H)
    bqkv = jnp.concatenate([params["bq"], params["bk"], params["bv"]], axis=1)
    wo = params["wo"].astype(bf16)
    w1 = params["w1"].astype(bf16)
    w2 = params["w2"].astype(bf16)

    tb = _choose_batch_tile(B, S1)
    rows = tb * S1
    grid = (B // tb,)

    def rep(shape):  # full-array block, replicated across the grid
        return pl.BlockSpec(shape, lambda b: tuple(0 for _ in shape))

    in_specs = [
        pl.BlockSpec((rows, H), lambda b: (b, 0)),    # x (TB examples per step)
        rep((H, 3 * H)), rep((1, 3 * H)),             # wqkv, bqkv
        rep((H, H)), rep((1, H)),                     # wo, bo
        rep((1, H)), rep((1, H)),                     # ln1 gamma, beta
        rep((H, F)), rep((1, F)),                     # w1, b1
        rep((F, H)), rep((1, H)),                     # w2, b2
        rep((1, H)), rep((1, H)),                     # ln2 gamma, beta
    ]

    # VMEM budget from actual buffer sizes (keeps the v7x 64 MiB TC safe).
    weight_args = (wqkv, bqkv, wo, params["bo"], params["ln1_g"],
                   params["ln1_b"], w1, params["b1"], w2, params["b2"],
                   params["ln2_g"], params["ln2_b"])
    weight_bytes = sum(int(a.size) * a.dtype.itemsize for a in weight_args)
    io_bytes = 2 * rows * H * 4                       # x block + out block (f32)
    vmem_bytes = 4 * (2 * io_bytes + 2 * weight_bytes) + (1 << 20)
    vmem_bytes = int(max(4 << 20, min(vmem_bytes, 48 << 20)))

    out_flat = pl.pallas_call(
        functools.partial(_joint_lm_kernel, s1=S1),
        out_shape=jax.ShapeDtypeStruct((B * S1, H), jnp.float32),
        grid_spec=pltpu.PrefetchScalarGridSpec(
            num_scalar_prefetch=0,
            grid=grid,
            in_specs=in_specs,
            out_specs=pl.BlockSpec((rows, H), lambda b: (b, 0)),
        ),
        compiler_params=pltpu.CompilerParams(
            dimension_semantics=("parallel",),
            vmem_limit_bytes=vmem_bytes),
    )(
        x, wqkv, bqkv, wo, params["bo"],
        params["ln1_g"], params["ln1_b"],
        w1, params["b1"], w2, params["b2"],
        params["ln2_g"], params["ln2_b"],
    )

    return out_flat.reshape(B, S1, H)


def _reference(num, cat, params):
    """Pure-JAX mirror of the kernel math (bf16 matmul operands, f32 accum)."""
    f32, bf16 = jnp.float32, jnp.bfloat16
    B, _, H = num.shape
    cls = jnp.broadcast_to(params["cls"][None].astype(f32), (B, 1, H))
    x = jnp.concatenate([num, cat, cls], axis=1)                  # (B, S1, H)

    def mm(a, w, b):
        return jnp.einsum("bsh,hk->bsk", a.astype(bf16), w.astype(bf16),
                          preferred_element_type=f32) + b

    q = mm(x, params["wq"], params["bq"]) / jnp.sqrt(jnp.float32(H))
    k = mm(x, params["wk"], params["bk"])
    v = mm(x, params["wv"], params["bv"])
    s = jnp.einsum("bqd,bkd->bqk", q.astype(bf16), k.astype(bf16),
                   preferred_element_type=f32)
    p = jax.nn.softmax(s, axis=-1)
    a = jnp.einsum("bqk,bkd->bqd", p.astype(bf16), v.astype(bf16),
                   preferred_element_type=f32)
    a = mm(a, params["wo"], params["bo"])

    h = x + a
    mu = h.mean(-1, keepdims=True)
    var = ((h - mu) ** 2).mean(-1, keepdims=True)
    h = (h - mu) * jax.lax.rsqrt(var + 1e-5) * params["ln1_g"] + params["ln1_b"]

    f = jax.nn.gelu(mm(h, params["w1"], params["b1"]))
    f = mm(f, params["w2"], params["b2"])
    h2 = h + f
    mu2 = h2.mean(-1, keepdims=True)
    var2 = ((h2 - mu2) ** 2).mean(-1, keepdims=True)
    return (h2 - mu2) * jax.lax.rsqrt(var2 + 1e-5) * params["ln2_g"] + params["ln2_b"]


def _init_params(key, H, F):
    ks = jax.random.split(key, 12)
    u = lambda k, shape, fan_in: jax.random.uniform(
        k, shape, jnp.float32, -1.0 / jnp.sqrt(fan_in), 1.0 / jnp.sqrt(fan_in))
    return {
        # AppendCLSToken weight, kaiming-uniform-style init
        "cls": u(ks[0], (1, H), H),
        "wq": u(ks[1], (H, H), H), "bq": jnp.zeros((1, H), jnp.float32),
        "wk": u(ks[2], (H, H), H), "bk": jnp.zeros((1, H), jnp.float32),
        "wv": u(ks[3], (H, H), H), "bv": jnp.zeros((1, H), jnp.float32),
        "wo": u(ks[4], (H, H), H), "bo": jnp.zeros((1, H), jnp.float32),
        "ln1_g": jnp.ones((1, H), jnp.float32), "ln1_b": jnp.zeros((1, H), jnp.float32),
        "w1": u(ks[5], (H, F), H), "b1": jnp.zeros((1, F), jnp.float32),
        "w2": u(ks[6], (F, H), F), "b2": jnp.zeros((1, H), jnp.float32),
        "ln2_g": jnp.ones((1, H), jnp.float32), "ln2_b": jnp.zeros((1, H), jnp.float32),
    }


if __name__ == "__main__":
    # sequence after CLS = 8; batch tile = 16 -> matmul M = 128, grid = (2,)
    B, Sn, Sc, H, F = 32, 4, 3, 32, 64

    key = jax.random.PRNGKey(0)
    k_num, k_cat, k_par = jax.random.split(key, 3)
    num_embeds = jax.random.normal(k_num, (B, Sn, H), jnp.float32)
    cat_embeds = jax.random.normal(k_cat, (B, Sc, H), jnp.float32)
    params = _init_params(k_par, H, F)

    out = joint_feature_extractor(num_embeds, cat_embeds, params)
    out = jax.block_until_ready(out)

    ref = _reference(num_embeds, cat_embeds, params)
    assert out.shape == (B, Sn + Sc + 1, H)
    max_err = float(jnp.abs(out - ref).max())
    assert jnp.allclose(out, ref, atol=2e-2, rtol=2e-2), max_err

    print("KERNEL_OK")
</pallas_src>

<mosaic_0001>
module attributes {stable_mosaic.version = 11 : i64} {
  func.func @_joint_lm_kernel(%arg0: i32, %arg1: memref<128x32xf32, #tpu.memory_space<vmem>>, %arg2: memref<32x96xbf16, #tpu.memory_space<vmem>>, %arg3: memref<1x96xf32, #tpu.memory_space<vmem>>, %arg4: memref<32x32xbf16, #tpu.memory_space<vmem>>, %arg5: memref<1x32xf32, #tpu.memory_space<vmem>>, %arg6: memref<1x32xf32, #tpu.memory_space<vmem>>, %arg7: memref<1x32xf32, #tpu.memory_space<vmem>>, %arg8: memref<32x64xbf16, #tpu.memory_space<vmem>>, %arg9: memref<1x64xf32, #tpu.memory_space<vmem>>, %arg10: memref<64x32xbf16, #tpu.memory_space<vmem>>, %arg11: memref<1x32xf32, #tpu.memory_space<vmem>>, %arg12: memref<1x32xf32, #tpu.memory_space<vmem>>, %arg13: memref<1x32xf32, #tpu.memory_space<vmem>>, %arg14: memref<128x32xf32, #tpu.memory_space<vmem>>) attributes {dimension_semantics = [#tpu.dimension_semantics<parallel>], iteration_bounds = array<i64: 2>, scalar_prefetch = 0 : i64, scratch_operands = 0 : i64, tpu.core_type = #tpu.core_type<tc>, window_params = [{transform_indices = @transform_0, window_bounds = array<i64: 128, 32>}, {pipeline_mode = #tpu.pipeline_mode<synchronous>, transform_indices = @transform_1, window_bounds = array<i64: 32, 96>}, {pipeline_mode = #tpu.pipeline_mode<synchronous>, transform_indices = @transform_2, window_bounds = array<i64: 1, 96>}, {pipeline_mode = #tpu.pipeline_mode<synchronous>, transform_indices = @transform_3, window_bounds = array<i64: 32, 32>}, {pipeline_mode = #tpu.pipeline_mode<synchronous>, transform_indices = @transform_4, window_bounds = array<i64: 1, 32>}, {pipeline_mode = #tpu.pipeline_mode<synchronous>, transform_indices = @transform_5, window_bounds = array<i64: 1, 32>}, {pipeline_mode = #tpu.pipeline_mode<synchronous>, transform_indices = @transform_6, window_bounds = array<i64: 1, 32>}, {pipeline_mode = #tpu.pipeline_mode<synchronous>, transform_indices = @transform_7, window_bounds = array<i64: 32, 64>}, {pipeline_mode = #tpu.pipeline_mode<synchronous>, transform_indices = @transform_8, window_bounds = array<i64: 1, 64>}, {pipeline_mode = #tpu.pipeline_mode<synchronous>, transform_indices = @transform_9, window_bounds = array<i64: 64, 32>}, {pipeline_mode = #tpu.pipeline_mode<synchronous>, transform_indices = @transform_10, window_bounds = array<i64: 1, 32>}, {pipeline_mode = #tpu.pipeline_mode<synchronous>, transform_indices = @transform_11, window_bounds = array<i64: 1, 32>}, {pipeline_mode = #tpu.pipeline_mode<synchronous>, transform_indices = @transform_12, window_bounds = array<i64: 1, 32>}, {transform_indices = @transform_13, window_bounds = array<i64: 128, 32>}]} {
    %c0 = arith.constant 0 : index
    %c0_0 = arith.constant 0 : index
    %0 = vector.load %arg1[%c0, %c0_0] : memref<128x32xf32, #tpu.memory_space<vmem>>, vector<128x32xf32>
    %1 = arith.truncf %0 : vector<128x32xf32> to vector<128x32xbf16>
    %c0_1 = arith.constant 0 : index
    %c0_2 = arith.constant 0 : index
    %2 = vector.load %arg2[%c0_1, %c0_2] : memref<32x96xbf16, #tpu.memory_space<vmem>>, vector<32x96xbf16>
    %cst = arith.constant dense<0.000000e+00> : vector<128x96xf32>
    %3 = tpu.matmul %1, %2, %cst {dimension_numbers = #tpu.dot_dimension_numbers<[1], [0], [0], [1], [0, 0, 1, 1], [], []>} : vector<128x32xbf16>, vector<32x96xbf16>, vector<128x96xf32> -> vector<128x96xf32>
    %c0_3 = arith.constant 0 : index
    %c0_4 = arith.constant 0 : index
    %4 = vector.load %arg3[%c0_3, %c0_4] : memref<1x96xf32, #tpu.memory_space<vmem>>, vector<1x96xf32>
    %5 = vector.broadcast %4 : vector<1x96xf32> to vector<128x96xf32>
    %6 = arith.addf %3, %5 : vector<128x96xf32>
    %cst_5 = arith.constant 3.200000e+01 : f32
    %7 = math.sqrt %cst_5 : f32
    %cst_6 = arith.constant 1.000000e+00 : f32
    %8 = arith.divf %cst_6, %7 : f32
    %9 = vector.extract_strided_slice %6 {offsets = [0, 0], sizes = [128, 32], strides = [1, 1]} : vector<128x96xf32> to vector<128x32xf32>
    %10 = vector.broadcast %8 : f32 to vector<128x32xf32>
    %11 = arith.mulf %9, %10 : vector<128x32xf32>
    %12 = vector.shape_cast %11 : vector<128x32xf32> to vector<16x8x32xf32>
    %13 = arith.truncf %12 : vector<16x8x32xf32> to vector<16x8x32xbf16>
    %14 = vector.extract_strided_slice %6 {offsets = [0, 32], sizes = [128, 32], strides = [1, 1]} : vector<128x96xf32> to vector<128x32xf32>
    %15 = vector.shape_cast %14 : vector<128x32xf32> to vector<16x8x32xf32>
    %16 = arith.truncf %15 : vector<16x8x32xf32> to vector<16x8x32xbf16>
    %17 = vector.extract_strided_slice %6 {offsets = [0, 64], sizes = [128, 32], strides = [1, 1]} : vector<128x96xf32> to vector<128x32xf32>
    %18 = vector.shape_cast %17 : vector<128x32xf32> to vector<16x8x32xf32>
    %19 = arith.truncf %18 : vector<16x8x32xf32> to vector<16x8x32xbf16>
    %cst_7 = arith.constant dense<0.000000e+00> : vector<16x8x8xf32>
    %20 = tpu.matmul %13, %16, %cst_7 {dimension_numbers = #tpu.dot_dimension_numbers<[2], [2], [1], [1], [0, 0, 0, 1, 1, 1], [0], [0]>} : vector<16x8x32xbf16>, vector<16x8x32xbf16>, vector<16x8x8xf32> -> vector<16x8x8xf32>
    %cst_8 = arith.constant dense<0xFF800000> : vector<16x8xf32>
    %21 = vector.multi_reduction <maximumf>, %20, %cst_8 [2] : vector<16x8x8xf32> to vector<16x8xf32>
    %22 = vector.shape_cast %21 : vector<16x8xf32> to vector<16x8x1xf32>
    %23 = vector.broadcast %22 : vector<16x8x1xf32> to vector<16x8x8xf32>
    %24 = arith.subf %20, %23 : vector<16x8x8xf32>
    %25 = math.exp %24 : vector<16x8x8xf32>
    %cst_9 = arith.constant dense<0.000000e+00> : vector<16x8xf32>
    %26 = vector.multi_reduction <add>, %25, %cst_9 [2] : vector<16x8x8xf32> to vector<16x8xf32>
    %27 = vector.shape_cast %26 : vector<16x8xf32> to vector<16x8x1xf32>
    %28 = tpu.reciprocal %27 {approx = true} : vector<16x8x1xf32> -> vector<16x8x1xf32>
    %29 = vector.broadcast %28 : vector<16x8x1xf32> to vector<16x8x8xf32>
    %30 = arith.mulf %25, %29 : vector<16x8x8xf32>
    %31 = arith.truncf %30 : vector<16x8x8xf32> to vector<16x8x8xbf16>
    %cst_10 = arith.constant dense<0.000000e+00> : vector<16x8x32xf32>
    %32 = tpu.matmul %31, %19, %cst_10 {dimension_numbers = #tpu.dot_dimension_numbers<[2], [1], [1], [2], [0, 0, 0, 1, 1, 2], [0], [0]>} : vector<16x8x8xbf16>, vector<16x8x32xbf16>, vector<16x8x32xf32> -> vector<16x8x32xf32>
    %33 = vector.shape_cast %32 : vector<16x8x32xf32> to vector<128x32xf32>
    %34 = arith.truncf %33 : vector<128x32xf32> to vector<128x32xbf16>
    %c0_11 = arith.constant 0 : index
    %c0_12 = arith.constant 0 : index
    %35 = vector.load %arg4[%c0_11, %c0_12] : memref<32x32xbf16, #tpu.memory_space<vmem>>, vector<32x32xbf16>
    %cst_13 = arith.constant dense<0.000000e+00> : vector<128x32xf32>
    %36 = tpu.matmul %34, %35, %cst_13 {dimension_numbers = #tpu.dot_dimension_numbers<[1], [0], [0], [1], [0, 0, 1, 1], [], []>} : vector<128x32xbf16>, vector<32x32xbf16>, vector<128x32xf32> -> vector<128x32xf32>
    %c0_14 = arith.constant 0 : index
    %c0_15 = arith.constant 0 : index
    %37 = vector.load %arg5[%c0_14, %c0_15] : memref<1x32xf32, #tpu.memory_space<vmem>>, vector<1x32xf32>
    %38 = vector.broadcast %37 : vector<1x32xf32> to vector<128x32xf32>
    %39 = arith.addf %36, %38 : vector<128x32xf32>
    %40 = arith.addf %0, %39 : vector<128x32xf32>
    %cst_16 = arith.constant dense<0.000000e+00> : vector<128xf32>
    %41 = vector.multi_reduction <add>, %40, %cst_16 [1] : vector<128x32xf32> to vector<128xf32>
    %42 = vector.shape_cast %41 : vector<128xf32> to vector<128x1xf32>
    %cst_17 = arith.constant 3.200000e+01 : f32
    %43 = vector.broadcast %cst_17 : f32 to vector<128x1xf32>
    %44 = arith.divf %42, %43 : vector<128x1xf32>
    %45 = vector.broadcast %44 : vector<128x1xf32> to vector<128x32xf32>
    %46 = arith.subf %40, %45 : vector<128x32xf32>
    %47 = arith.mulf %46, %46 : vector<128x32xf32>
    %cst_18 = arith.constant dense<0.000000e+00> : vector<128xf32>
    %48 = vector.multi_reduction <add>, %47, %cst_18 [1] : vector<128x32xf32> to vector<128xf32>
    %49 = vector.shape_cast %48 : vector<128xf32> to vector<128x1xf32>
    %cst_19 = arith.constant 3.200000e+01 : f32
    %50 = vector.broadcast %cst_19 : f32 to vector<128x1xf32>
    %51 = arith.divf %49, %50 : vector<128x1xf32>
    %52 = vector.broadcast %44 : vector<128x1xf32> to vector<128x32xf32>
    %53 = arith.subf %40, %52 : vector<128x32xf32>
    %cst_20 = arith.constant 9.99999974E-6 : f32
    %54 = vector.broadcast %cst_20 : f32 to vector<128x1xf32>
    %55 = arith.addf %51, %54 : vector<128x1xf32>
    %56 = math.rsqrt %55 : vector<128x1xf32>
    %57 = vector.broadcast %56 : vector<128x1xf32> to vector<128x32xf32>
    %58 = arith.mulf %53, %57 : vector<128x32xf32>
    %c0_21 = arith.constant 0 : index
    %c0_22 = arith.constant 0 : index
    %59 = vector.load %arg6[%c0_21, %c0_22] : memref<1x32xf32, #tpu.memory_space<vmem>>, vector<1x32xf32>
    %60 = vector.broadcast %59 : vector<1x32xf32> to vector<128x32xf32>
    %61 = arith.mulf %58, %60 : vector<128x32xf32>
    %c0_23 = arith.constant 0 : index
    %c0_24 = arith.constant 0 : index
    %62 = vector.load %arg7[%c0_23, %c0_24] : memref<1x32xf32, #tpu.memory_space<vmem>>, vector<1x32xf32>
    %63 = vector.broadcast %62 : vector<1x32xf32> to vector<128x32xf32>
    %64 = arith.addf %61, %63 : vector<128x32xf32>
    %65 = arith.truncf %64 : vector<128x32xf32> to vector<128x32xbf16>
    %c0_25 = arith.constant 0 : index
    %c0_26 = arith.constant 0 : index
    %66 = vector.load %arg8[%c0_25, %c0_26] : memref<32x64xbf16, #tpu.memory_space<vmem>>, vector<32x64xbf16>
    %cst_27 = arith.constant dense<0.000000e+00> : vector<128x64xf32>
    %67 = tpu.matmul %65, %66, %cst_27 {dimension_numbers = #tpu.dot_dimension_numbers<[1], [0], [0], [1], [0, 0, 1, 1], [], []>} : vector<128x32xbf16>, vector<32x64xbf16>, vector<128x64xf32> -> vector<128x64xf32>
    %c0_28 = arith.constant 0 : index
    %c0_29 = arith.constant 0 : index
    %68 = vector.load %arg9[%c0_28, %c0_29] : memref<1x64xf32, #tpu.memory_space<vmem>>, vector<1x64xf32>
    %69 = vector.broadcast %68 : vector<1x64xf32> to vector<128x64xf32>
    %70 = arith.addf %67, %69 : vector<128x64xf32>
    %71 = arith.mulf %70, %70 : vector<128x64xf32>
    %72 = arith.mulf %70, %71 : vector<128x64xf32>
    %cst_30 = arith.constant 4.471500e-02 : f32
    %73 = vector.broadcast %cst_30 : f32 to vector<128x64xf32>
    %74 = arith.mulf %73, %72 : vector<128x64xf32>
    %75 = arith.addf %70, %74 : vector<128x64xf32>
    %cst_31 = arith.constant 0.797884583 : f32
    %76 = vector.broadcast %cst_31 : f32 to vector<128x64xf32>
    %77 = arith.mulf %76, %75 : vector<128x64xf32>
    %78 = math.tanh %77 : vector<128x64xf32>
    %cst_32 = arith.constant 1.000000e+00 : f32
    %79 = vector.broadcast %cst_32 : f32 to vector<128x64xf32>
    %80 = arith.addf %79, %78 : vector<128x64xf32>
    %cst_33 = arith.constant 5.000000e-01 : f32
    %81 = vector.broadcast %cst_33 : f32 to vector<128x64xf32>
    %82 = arith.mulf %81, %80 : vector<128x64xf32>
    %83 = arith.mulf %70, %82 : vector<128x64xf32>
    %84 = arith.truncf %83 : vector<128x64xf32> to vector<128x64xbf16>
    %c0_34 = arith.constant 0 : index
    %c0_35 = arith.constant 0 : index
    %85 = vector.load %arg10[%c0_34, %c0_35] : memref<64x32xbf16, #tpu.memory_space<vmem>>, vector<64x32xbf16>
    %cst_36 = arith.constant dense<0.000000e+00> : vector<128x32xf32>
    %86 = tpu.matmul %84, %85, %cst_36 {dimension_numbers = #tpu.dot_dimension_numbers<[1], [0], [0], [1], [0, 0, 1, 1], [], []>} : vector<128x64xbf16>, vector<64x32xbf16>, vector<128x32xf32> -> vector<128x32xf32>
    %c0_37 = arith.constant 0 : index
    %c0_38 = arith.constant 0 : index
    %87 = vector.load %arg11[%c0_37, %c0_38] : memref<1x32xf32, #tpu.memory_space<vmem>>, vector<1x32xf32>
    %88 = vector.broadcast %87 : vector<1x32xf32> to vector<128x32xf32>
    %89 = arith.addf %86, %88 : vector<128x32xf32>
    %90 = arith.addf %64, %89 : vector<128x32xf32>
    %cst_39 = arith.constant dense<0.000000e+00> : vector<128xf32>
    %91 = vector.multi_reduction <add>, %90, %cst_39 [1] : vector<128x32xf32> to vector<128xf32>
    %92 = vector.shape_cast %91 : vector<128xf32> to vector<128x1xf32>
    %cst_40 = arith.constant 3.200000e+01 : f32
    %93 = vector.broadcast %cst_40 : f32 to vector<128x1xf32>
    %94 = arith.divf %92, %93 : vector<128x1xf32>
    %95 = vector.broadcast %94 : vector<128x1xf32> to vector<128x32xf32>
    %96 = arith.subf %90, %95 : vector<128x32xf32>
    %97 = arith.mulf %96, %96 : vector<128x32xf32>
    %cst_41 = arith.constant dense<0.000000e+00> : vector<128xf32>
    %98 = vector.multi_reduction <add>, %97, %cst_41 [1] : vector<128x32xf32> to vector<128xf32>
    %99 = vector.shape_cast %98 : vector<128xf32> to vector<128x1xf32>
    %cst_42 = arith.constant 3.200000e+01 : f32
    %100 = vector.broadcast %cst_42 : f32 to vector<128x1xf32>
    %101 = arith.divf %99, %100 : vector<128x1xf32>
    %102 = vector.broadcast %94 : vector<128x1xf32> to vector<128x32xf32>
    %103 = arith.subf %90, %102 : vector<128x32xf32>
    %cst_43 = arith.constant 9.99999974E-6 : f32
    %104 = vector.broadcast %cst_43 : f32 to vector<128x1xf32>
    %105 = arith.addf %101, %104 : vector<128x1xf32>
    %106 = math.rsqrt %105 : vector<128x1xf32>
    %107 = vector.broadcast %106 : vector<128x1xf32> to vector<128x32xf32>
    %108 = arith.mulf %103, %107 : vector<128x32xf32>
    %c0_44 = arith.constant 0 : index
    %c0_45 = arith.constant 0 : index
    %109 = vector.load %arg12[%c0_44, %c0_45] : memref<1x32xf32, #tpu.memory_space<vmem>>, vector<1x32xf32>
    %110 = vector.broadcast %109 : vector<1x32xf32> to vector<128x32xf32>
    %111 = arith.mulf %108, %110 : vector<128x32xf32>
    %c0_46 = arith.constant 0 : index
    %c0_47 = arith.constant 0 : index
    %112 = vector.load %arg13[%c0_46, %c0_47] : memref<1x32xf32, #tpu.memory_space<vmem>>, vector<1x32xf32>
    %113 = vector.broadcast %112 : vector<1x32xf32> to vector<128x32xf32>
    %114 = arith.addf %111, %113 : vector<128x32xf32>
    %c0_48 = arith.constant 0 : index
    %c0_49 = arith.constant 0 : index
    %115 = vector.load %arg14[%c0_48, %c0_49] : memref<128x32xf32, #tpu.memory_space<vmem>>, vector<128x32xf32>
    tpu.vector_store %arg14[%c0_48, %c0_49], %114 {strides = array<i32>} : memref<128x32xf32, #tpu.memory_space<vmem>>, vector<128x32xf32>,
    return
  }
  func.func @transform_0(%arg0: i32) -> (i32, i32) {
    %c0_i32 = arith.constant 0 : i32
    %c0_i32_0 = arith.constant 0 : i32
    return %arg0, %c0_i32 : i32, i32
  }
  func.func @transform_1(%arg0: i32) -> (i32, i32) {
    %c0_i32 = arith.constant 0 : i32
    %c0_i32_0 = arith.constant 0 : i32
    %c0_i32_1 = arith.constant 0 : i32
    return %c0_i32, %c0_i32_0 : i32, i32
  }
  func.func @transform_2(%arg0: i32) -> (i32, i32) {
    %c0_i32 = arith.constant 0 : i32
    %c0_i32_0 = arith.constant 0 : i32
    %c0_i32_1 = arith.constant 0 : i32
    return %c0_i32, %c0_i32_0 : i32, i32
  }
  func.func @transform_3(%arg0: i32) -> (i32, i32) {
    %c0_i32 = arith.constant 0 : i32
    %c0_i32_0 = arith.constant 0 : i32
    %c0_i32_1 = arith.constant 0 : i32
    return %c0_i32, %c0_i32_0 : i32, i32
  }
  func.func @transform_4(%arg0: i32) -> (i32, i32) {
    %c0_i32 = arith.constant 0 : i32
    %c0_i32_0 = arith.constant 0 : i32
    %c0_i32_1 = arith.constant 0 : i32
    return %c0_i32, %c0_i32_0 : i32, i32
  }
  func.func @transform_5(%arg0: i32) -> (i32, i32) {
    %c0_i32 = arith.constant 0 : i32
    %c0_i32_0 = arith.constant 0 : i32
    %c0_i32_1 = arith.constant 0 : i32
    return %c0_i32, %c0_i32_0 : i32, i32
  }
  func.func @transform_6(%arg0: i32) -> (i32, i32) {
    %c0_i32 = arith.constant 0 : i32
    %c0_i32_0 = arith.constant 0 : i32
    %c0_i32_1 = arith.constant 0 : i32
    return %c0_i32, %c0_i32_0 : i32, i32
  }
  func.func @transform_7(%arg0: i32) -> (i32, i32) {
    %c0_i32 = arith.constant 0 : i32
    %c0_i32_0 = arith.constant 0 : i32
    %c0_i32_1 = arith.constant 0 : i32
    return %c0_i32, %c0_i32_0 : i32, i32
  }
  func.func @transform_8(%arg0: i32) -> (i32, i32) {
    %c0_i32 = arith.constant 0 : i32
    %c0_i32_0 = arith.constant 0 : i32
    %c0_i32_1 = arith.constant 0 : i32
    return %c0_i32, %c0_i32_0 : i32, i32
  }
  func.func @transform_9(%arg0: i32) -> (i32, i32) {
    %c0_i32 = arith.constant 0 : i32
    %c0_i32_0 = arith.constant 0 : i32
    %c0_i32_1 = arith.constant 0 : i32
    return %c0_i32, %c0_i32_0 : i32, i32
  }
  func.func @transform_10(%arg0: i32) -> (i32, i32) {
    %c0_i32 = arith.constant 0 : i32
    %c0_i32_0 = arith.constant 0 : i32
    %c0_i32_1 = arith.constant 0 : i32
    return %c0_i32, %c0_i32_0 : i32, i32
  }
  func.func @transform_11(%arg0: i32) -> (i32, i32) {
    %c0_i32 = arith.constant 0 : i32
    %c0_i32_0 = arith.constant 0 : i32
    %c0_i32_1 = arith.constant 0 : i32
    return %c0_i32, %c0_i32_0 : i32, i32
  }
  func.func @transform_12(%arg0: i32) -> (i32, i32) {
    %c0_i32 = arith.constant 0 : i32
    %c0_i32_0 = arith.constant 0 : i32
    %c0_i32_1 = arith.constant 0 : i32
    return %c0_i32, %c0_i32_0 : i32, i32
  }
  func.func @transform_13(%arg0: i32) -> (i32, i32) {
    %c0_i32 = arith.constant 0 : i32
    %c0_i32_0 = arith.constant 0 : i32
    return %arg0, %c0_i32 : i32, i32
  }
}

</mosaic_0001>

<bundles_post_ra>
// kernel: tpu_custom_call.1
= control target key start
LH: loop header
LB: loop body
LE: loop exit
PB: predicated region body
PF: predicated region fallthrough
CT: control target
= control target key end

     0   :  { %s4397_s25 = smov 0   ;;  %s5646_s0 = inlined_call_operand.vmem [shape: f32[256,32], index: 0, kind: input, shape index: {}]   ;;  %s5647_s1 = inlined_call_operand.vmem [shape: bf16[32,96], index: 1, kind: input, shape index: {}]   ;;  %s5648_s2 = inlined_call_operand.vmem [shape: f32[1,96], index: 2, kind: input, shape index: {}]   ;;  %s5649_s3 = inlined_call_operand.vmem [shape: bf16[32,32], index: 3, kind: input, shape index: {}]   ;;  %s5650_s4 = inlined_call_operand.vmem [shape: f32[1,32], index: 4, kind: input, shape index: {}]   ;;  %s5651_s5 = inlined_call_operand.vmem [shape: f32[1,32], index: 5, kind: input, shape index: {}]   ;;  %s5652_s6 = inlined_call_operand.vmem [shape: f32[1,32], index: 6, kind: input, shape index: {}]   ;;  %s5653_s7 = inlined_call_operand.vmem [shape: bf16[32,64], index: 7, kind: input, shape index: {}]   ;;  %s5654_s8 = inlined_call_operand.vmem [shape: f32[1,64], index: 8, kind: input, shape index: {}]   ;;  %s5655_s9 = inlined_call_operand.vmem [shape: bf16[64,32], index: 9, kind: input, shape index: {}]   ;;  %s5656_s10 = inlined_call_operand.vmem [shape: f32[1,32], index: 10, kind: input, shape index: {}]   ;;  %s5657_s11 = inlined_call_operand.vmem [shape: f32[1,32], index: 11, kind: input, shape index: {}]   ;;  %s5658_s12 = inlined_call_operand.vmem [shape: f32[1,32], index: 12, kind: input, shape index: {}]   ;;  %s5659_s13 = inlined_call_operand.vmem [shape: f32[256,32], index: 13, kind: output, shape index: {}]  }
   0x1 LB: > { %s3638_s26 = sadd.s32 4294967295, %s4321_s25   ;;  %p3642_p0 = scmp.ge.s32.totalorder %s4321_s25, 1  ;;  %s4321_s25 = sphi %s4397_s25, %s23_s25  }
   0x2   : > { %p388_p1 = scmp.lt.s32.totalorder %s4321_s25, 3 }
   0x4   : > { %p389_p2 = pnand %p3642_p0, %p388_p1 }
   0x5   : > { %v4129_v0 = vld [vmem:[%s5647_s1] sm:$0xff] (!%p389_p2)   ;;  %s3643_s29 = sshll.u32 (!%p389_p2), %s3638_s26, 4  ;;  %v4130_v1 = vld [vmem:[%s5647_s1 + $0x8] sm:$0xff] (!%p389_p2)   ;;  %vm492_vm0 = vcmask (!%p389_p2), 261120   ;;  %v4323_v26 = vmov (!%p389_p2), 0.0   ;;  %vm4324_vm1 = vmmov (!%p389_p2), 0  }
   0x6   : > { %392 = sbr.rel (%p389_p2) target bundleno = 2541 (0x9ed), region = 72  ;;  %p433_p3 = scmp.lt.s32.totalorder (!%p389_p2), %s3643_s29, 31  ;;  %3837 = vmatprep.subr.bf16.mxu0 (!%p389_p2), %v4129_v0  ;;  %4113 = vmatprep.subr.bf16.mxu1 (!%p389_p2), %v4129_v0  ;;  %v3647_v27 = vld [vmem:[%s5648_s2] ss:$0 sm:$0xff] (!%p389_p2)  ;;  %vm1644_vm2 = vcmask (!%p389_p2), 1043456   ;;  %vm1446_vm3 = vcmask (!%p389_p2), 64512  }
   0x7   : > { %3838 = vmatpush3.bf16.msra.mxu0 (!%p389_p2), %v4129_v0  ;;  %4115 = vmatpush3.bf16.msra.mxu1 (!%p389_p2), %v4129_v0  ;;  %s4325_s21 = smov (!%p389_p2), 96   ;;  %s4326_s22 = smov (!%p389_p2), 64   ;;  %vm3174_vm4 = vcmask (!%p389_p2), 523264  }
   0x8   : > { %3839 = vmatprep.subr.bf16.mxu0 (!%p389_p2), %v4130_v1  ;;  %4114 = vmatprep.subr.bf16.mxu1 (!%p389_p2), %v4130_v1 }
   0xb   : > { %3840 = vmatpush3.bf16.msra.mxu0 (!%p389_p2), %v4130_v1  ;;  %4116 = vmatpush3.bf16.msra.mxu1 (!%p389_p2), %v4130_v1 }
   0xc   : > { %3857 = vmatprep.subr.bf16.mxu1 (!%p389_p2), %v4323_v26  ;;  %3881 = vmatprep.subr.bf16.mxu0 (!%p389_p2), %v4323_v26 }
   0xd   : > { %s5661_s29 = smov (!%p433_p3, %s3643_s29), 31 }
   0xe   : > { %s3644_s15 = sshll.u32 %s5661_s29, 3 }
   0xf   : > { %s4419_s18 = scalar_lea.vmem %s5646_s0, %s3644_s15  ;;  %s5564_s28 = scalar_lea.vmem %s5659_s13, %s3644_s15 }
  0x10   : > { %v445_v2 = vld [vmem:[%s4419_s18] sm:$0xff]  ;;  %v446_v3 = vld [vmem:[%s4419_s18 + $0x8] sm:$0xff]  ;;  %v447_v4 = vld [vmem:[%s4419_s18 + $0x10] sm:$0xff] }
  0x11   : > { %v461_v5 = vpack.c.bf16 %v446_v3, %v445_v2  ;;  %v448_v6 = vld [vmem:[%s4419_s18 + $0x18] sm:$0xff]  ;;  %v449_v7 = vld [vmem:[%s4419_s18 + $0x20] sm:$0xff]  ;;  %v450_v8 = vld [vmem:[%s4419_s18 + $0x28] sm:$0xff] }
  0x12   : > { %v462_v9 = vpack.c.bf16 %v448_v6, %v447_v4  ;;  %v463_v10 = vpack.c.bf16 %v450_v8, %v449_v7  ;;  %v453_v11 = vld [vmem:[%s4419_s18 + $0x40] sm:$0xff]  ;;  %v454_v12 = vld [vmem:[%s4419_s18 + $0x48] sm:$0xff]  ;;  %v455_v13 = vld [vmem:[%s4419_s18 + $0x50] sm:$0xff] }
  0x13   : > { %3841 = vmatprep.mubr.msk.bf16.mxu0 %vm492_vm0, %v461_v5  ;;  %v456_v14 = vld [vmem:[%s4419_s18 + $0x58] sm:$0xff]  ;;  %v451_v15 = vld [vmem:[%s4419_s18 + $0x30] sm:$0xff]  ;;  %v465_v16 = vpack.c.bf16 %v454_v12, %v453_v11  ;;  %v457_v18 = vld [vmem:[%s4419_s18 + $0x60] sm:$0xff] }
  0x14   : > { %3842 = vmatmul.mubr.msk.bf16.vlgmr.msra.gmra.mrb[0].mxu0 %vm492_vm0, %v462_v9  ;;  %v466_v17 = vpack.c.bf16 %v456_v14, %v455_v13  ;;  %v458_v19 = vld [vmem:[%s4419_s18 + $0x68] sm:$0xff]  ;;  %v452_v20 = vld [vmem:[%s4419_s18 + $0x38] sm:$0xff]  ;;  %v459_v23 = vld [vmem:[%s4419_s18 + $0x70] sm:$0xff] }
  0x15   : > { %3845 = vmatprep.mubr.msk.bf16.mxu0 %vm492_vm0, %v463_v10  ;;  %v467_v21 = vpack.c.bf16 %v458_v19, %v457_v18  ;;  %3849 = vmatprep.mubr.msk.bf16.mxu1 %vm492_vm0, %v465_v16  ;;  %v464_v22 = vpack.c.bf16 %v452_v20, %v451_v15  ;;  %v460_v24 = vld [vmem:[%s4419_s18 + $0x78] sm:$0xff] }
  0x16   : > { %3850 = vmatmul.mubr.msk.bf16.vlgmr.msra.gmra.mrb[0].mxu1 %vm492_vm0, %v466_v17  ;;  %v468_v25 = vpack.c.bf16 %v460_v24, %v459_v23 }
  0x17   : > { %3853 = vmatprep.mubr.msk.bf16.mxu1 %vm492_vm0, %v467_v21 }
  0x1c   : > { %3846 = vmatmul.mubr.msk.bf16.gmra.mrb[4].mxu0 %vm492_vm0, %v464_v22 }
  0x1d   : > { %3883 = vmatprep.mubr.msk.bf16.mxu0 %vm4324_vm1, %v4323_v26 }
  0x1e   : > { %3854 = vmatmul.mubr.msk.bf16.gmra.mrb[4].mxu1 %vm492_vm0, %v468_v25 }
  0x1f   : > { %3859 = vmatprep.mubr.msk.bf16.mxu1 %vm4324_vm1, %v4323_v26 }
  0xe7   : > { %v3843_v28 = vpop.f32.mrb[0].mxu0 }
  0xe8   : > { %v4454_v29 = vadd.f32 %v3843_v28, %v3647_v27  ;;  %v551_v30 = vpop.f32.mrb[1].mxu0 }
  0xe9   : > { %v4456_v31 = vadd.f32 %v3647_v27, %v551_v30  ;;  %v3844_v32 = vpop.f32.mrb[2].mxu0  ;;  %v3851_v36 = vpop.f32.mrb[0].mxu1 }
  0xea   : > { %v4458_v33 = vadd.f32 %v3844_v32, %v3647_v27  ;;  %v554_v34 = vpop.f32.mrb[3].mxu0  ;;  %v648_v35 = vpack.c.bf16 %v4454_v29, %v4454_v29  ;;  %v583_v39 = vpop.f32.mrb[1].mxu1  ;;  %v4496_v62 = vadd.f32 %v3851_v36, %v3647_v27  ;;  %v616_v32 = vmul.f32 0.17677669, %v4454_v29 }
  0xeb   : > { %v4462_v37 = vadd.f32 %v3647_v27, %v554_v34  ;;  %v646_v38 = vpack.c.bf16 %v4456_v31, %v4456_v31  ;;  %v3852_v40 = vpop.f32.mrb[2].mxu1  ;;  %v4489_v58 = vadd.f32 %v3647_v27, %v583_v39  ;;  %v614_v14 = vmul.f32 0.17677669, %v4456_v31 }
  0xec   : > { %761 = vrot.lane.b32.xlu1 %v648_v35, %s4325_s21  ;;  %v586_v41 = vpop.f32.mrb[3].mxu1  ;;  %v649_v42 = vpack.c.bf16 %v4458_v33, %v4458_v33  ;;  %v4501_v0 = vadd.f32 %v3852_v40, %v3647_v27  ;;  %v4510_v2 = vpack.c.bf16 %v4496_v62, %v4496_v62  ;;  %v632_v36 = vpack.c.bf16 %v616_v32, %v616_v32 }
  0xed   : > { %663 = vrot.lane.b32.xlu0 %v646_v38, %s4325_s21  ;;  %v647_v43 = vpack.c.bf16 %v4462_v37, %v4462_v37  ;;  %v4494_v61 = vadd.f32 %v3647_v27, %v586_v41  ;;  %v654_v63 = vpack.c.bf16 %v4489_v58, %v4489_v58  ;;  %v630_v16 = vpack.c.bf16 %v614_v14, %v614_v14 }
  0xee   : > { %v4517_v4 = vpack.c.bf16 %v4501_v0, %v4501_v0  ;;  %v615_v21 = vmul.f32 0.17677669, %v4462_v37  ;;  %v617_v40 = vmul.f32 0.17677669, %v4458_v33  ;;  %v622_v41 = vmul.f32 0.17677669, %v4489_v58 }
  0xef   : > { %v3847_v44 = vpop.f32.mrb[4].mxu0  ;;  %v4505_v1 = vpack.c.bf16 %v4494_v61, %v4494_v61 }
  0xf0   : > { %810 = vrot.lane.b32.xlu1 %v649_v42, %s4325_s21  ;;  %v567_v45 = vpop.f32.mrb[5].mxu0  ;;  %v4473_v46 = vadd.f32 %v3847_v44, %v3647_v27  ;;  %v631_v25 = vpack.c.bf16 %v615_v21, %v615_v21  ;;  %v633_v44 = vpack.c.bf16 %v617_v40, %v617_v40 }
  0xf1   : > { %v4475_v47 = vadd.f32 %v3647_v27, %v567_v45  ;;  %v3848_v48 = vpop.f32.mrb[6].mxu0  ;;  %712 = vrot.lane.b32.xlu0 %v647_v43, %s4325_s21  ;;  %v3855_v50 = vpop.f32.mrb[4].mxu1  ;;  %v638_v45 = vpack.c.bf16 %v622_v41, %v622_v41 }
  0xf2   : > { %v570_v49 = vpop.f32.mrb[7].mxu0  ;;  %v4480_v52 = vadd.f32 %v3848_v48, %v3647_v27  ;;  %v599_v54 = vpop.f32.mrb[5].mxu1  ;;  %v652_v56 = vpack.c.bf16 %v4473_v46, %v4473_v46  ;;  %v4523_v6 = vadd.f32 %v3855_v50, %v3647_v27  ;;  %v620_v34 = vmul.f32 0.17677669, %v4473_v46 }
  0xf3   : > { %v650_v51 = vpack.c.bf16 %v4475_v47, %v4475_v47  ;;  %v4482_v53 = vadd.f32 %v3647_v27, %v570_v49  ;;  %v3856_v55 = vpop.f32.mrb[6].mxu1  ;;  %v4513_v3 = vadd.f32 %v3647_v27, %v599_v54  ;;  %v618_v22 = vmul.f32 0.17677669, %v4475_v47 }
  0xf4   : > { %v602_v59 = vpop.f32.mrb[7].mxu1  ;;  %v653_v60 = vpack.c.bf16 %v4480_v52, %v4480_v52  ;;  %v4531_v8 = vadd.f32 %v3856_v55, %v3647_v27  ;;  %v4541_v10 = vpack.c.bf16 %v4523_v6, %v4523_v6  ;;  %v636_v37 = vpack.c.bf16 %v620_v34, %v620_v34 }
  0xf5   : > { %v651_v57 = vpack.c.bf16 %v4482_v53, %v4482_v53  ;;  %859 = vrot.lane.b32.xlu0 %v650_v51, %s4325_s21  ;;  %v4521_v5 = vadd.f32 %v3647_v27, %v602_v59  ;;  %v4527_v7 = vpack.c.bf16 %v4513_v3, %v4513_v3  ;;  %v634_v27 = vpack.c.bf16 %v618_v22, %v618_v22 }
  0xf6   : > { %v4547_v11 = vpack.c.bf16 %v4531_v8, %v4531_v8  ;;  %v619_v47 = vmul.f32 0.17677669, %v4482_v53  ;;  %v624_v48 = vmul.f32 0.17677669, %v4496_v62  ;;  %v626_v58 = vmul.f32 0.17677669, %v4513_v3 }
  0xf7   : > { %908 = vrot.lane.b32.xlu1 %v651_v57, %s4325_s21  ;;  %v4535_v9 = vpack.c.bf16 %v4521_v5, %v4521_v5  ;;  %v623_v3 = vmul.f32 0.17677669, %v4494_v61  ;;  %v629_v22 = vmul.f32 0.17677669, %v4531_v8 }
  0xf8   : > { %v640_v54 = vpack.c.bf16 %v624_v48, %v624_v48  ;;  %v642_v62 = vpack.c.bf16 %v626_v58, %v626_v58 }
  0xf9   : > { %957 = vrot.lane.b32.xlu0 %v652_v56, %s4325_s21 }
  0xfb   : > { %1006 = vrot.lane.b32.xlu1 %v653_v60, %s4325_s21 }
  0xfd   : > { %1055 = vrot.lane.b32.xlu0 %v654_v63, %s4325_s21 }
  0xff   : > { %1104 = vrot.lane.b32.xlu1 %v4505_v1, %s4325_s21 }
 0x101   : > { %1153 = vrot.lane.b32.xlu0 %v4510_v2, %s4325_s21 }
 0x103   : > { %1202 = vrot.lane.b32.xlu1 %v4517_v4, %s4325_s21 }
 0x105   : > { %1251 = vrot.lane.b32.xlu0 %v4527_v7, %s4325_s21 }
 0x107   : > { %1300 = vrot.lane.b32.xlu1 %v4535_v9, %s4325_s21 }
 0x109   : > { %1349 = vrot.lane.b32.xlu0 %v4541_v10, %s4325_s21 }
 0x10b   : > { %1398 = vrot.lane.b32.xlu1 %v4547_v11, %s4325_s21 }
 0x10d   : > { %1688 = vrot.lane.b32.xlu0 %v647_v43, %s4326_s22 }
 0x10f   : > { %1639 = vrot.lane.b32.xlu1 %v646_v38, %s4326_s22 }
 0x111   : > { %1784 = vrot.lane.b32.xlu0 %v649_v42, %s4326_s22 }
 0x113   : > { %1736 = vrot.lane.b32.xlu1 %v648_v35, %s4326_s22 }
 0x115   : > { %1976 = vrot.lane.b32.xlu0 %v653_v60, %s4326_s22 }
 0x117   : > { %1832 = vrot.lane.b32.xlu1 %v650_v51, %s4326_s22  ;;  %v635_v51 = vpack.c.bf16 %v619_v47, %v619_v47 }
 0x119   : > { %1880 = vrot.lane.b32.xlu0 %v651_v57, %s4326_s22  ;;  %v621_v57 = vmul.f32 0.17677669, %v4480_v52 }
 0x11b   : > { %1928 = vrot.lane.b32.xlu1 %v652_v56, %s4326_s22  ;;  %v637_v60 = vpack.c.bf16 %v621_v57, %v621_v57 }
 0x11f   : > { %2024 = vrot.lane.b32.xlu1 %v654_v63, %s4326_s22 }
 0x15e   : > { %v762_v17 = vpop.permute.xlu1 %761 }
 0x15f   : > { %v664_v12 = vpop.permute.xlu0 %663  ;;  %v767_v30 = vsel %vm492_vm0, %v762_v17, 0 }
 0x160   : > { %v669_v13 = vsel %vm492_vm0, %v664_v12, 0 }
 0x161   : > { %3858 = vmatpush3.bf16.xpose.msra.mxu1 %v669_v13  ;;  %v628_v13 = vmul.f32 0.17677669, %v4523_v6  ;;  %v625_v6 = vmul.f32 0.17677669, %v4501_v0  ;;  %v627_v0 = vmul.f32 0.17677669, %v4521_v5 }
 0x162   : > { %3863 = vmatprep.subr.bf16.mxu1 %v4323_v26  ;;  %v811_v23 = vpop.permute.xlu1 %810 }
 0x163   : > { %v713_v15 = vpop.permute.xlu0 %712  ;;  %v816_v29 = vsel %vm492_vm0, %v811_v23, 0 }
 0x164   : > { %v718_v19 = vsel %vm492_vm0, %v713_v15, 0  ;;  %v639_v15 = vpack.c.bf16 %v623_v3, %v623_v3 }
 0x167   : > { %v860_v18 = vpop.permute.xlu0 %859 }
 0x168   : > { %v865_v20 = vsel %vm492_vm0, %v860_v18, 0  ;;  %3860 = vmatmul.mubr.msk.bf16.vlgmr.msra.gmra.mrb[8].mxu1 %vm492_vm0, %v630_v16  ;;  %v644_v16 = vpack.c.bf16 %v628_v13, %v628_v13  ;;  %v641_v18 = vpack.c.bf16 %v625_v6, %v625_v6 }
 0x169   : > { %3864 = vmatpush3.bf16.xpose.msra.mxu1 %v718_v19  ;;  %3882 = vmatpush3.bf16.xpose.msra.mxu0 %v865_v20  ;;  %v909_v31 = vpop.permute.xlu1 %908  ;;  %v643_v20 = vpack.c.bf16 %v627_v0, %v627_v0 }
 0x16a   : > { %3865 = vmatprep.mubr.msk.bf16.mxu1 %vm4324_vm1, %v4323_v26  ;;  %3869 = vmatprep.subr.bf16.mxu1 %v4323_v26  ;;  %v914_v33 = vsel %vm492_vm0, %v909_v31, 0 }
 0x16b   : > { %3893 = vmatprep.subr.bf16.mxu0 %v4323_v26  ;;  %v958_v24 = vpop.permute.xlu0 %957 }
 0x16c   : > { %v963_v28 = vsel %vm492_vm0, %v958_v24, 0  ;;  %v645_v24 = vpack.c.bf16 %v629_v22, %v629_v22 }
 0x16d   : > { %v1007_v39 = vpop.permute.xlu1 %1006 }
 0x16e   : > { %v1012_v53 = vsel %vm492_vm0, %v1007_v39, 0 }
 0x16f   : > { %v1056_v35 = vpop.permute.xlu0 %1055 }
 0x170   : > { %3866 = vmatmul.mubr.msk.bf16.vlgmr.msra.gmra.mrb[12].mxu1 %vm492_vm0, %v631_v25  ;;  %3884 = vmatmul.mubr.msk.bf16.vlgmr.msra.gmra.mrb[8].mxu0 %vm492_vm0, %v634_v27  ;;  %v1061_v38 = vsel %vm492_vm0, %v1056_v35, 0 }
 0x171   : > { %3870 = vmatpush3.bf16.xpose.msra.mxu1 %v767_v30  ;;  %3894 = vmatpush3.bf16.xpose.msra.mxu0 %v963_v28  ;;  %v1105_v42 = vpop.permute.xlu1 %1104 }
 0x172   : > { %3895 = vmatprep.mubr.msk.bf16.mxu0 %vm4324_vm1, %v4323_v26  ;;  %3871 = vmatprep.mubr.msk.bf16.mxu1 %vm4324_vm1, %v4323_v26  ;;  %v1110_v52 = vsel %vm492_vm0, %v1105_v42, 0 }
 0x173   : > { %3875 = vmatprep.subr.bf16.mxu1 %v4323_v26  ;;  %3905 = vmatprep.subr.bf16.mxu0 %v4323_v26  ;;  %v1154_v43 = vpop.permute.xlu0 %1153 }
 0x174   : > { %v1159_v46 = vsel %vm492_vm0, %v1154_v43, 0 }
 0x175   : > { %v1203_v49 = vpop.permute.xlu1 %1202 }
 0x176   : > { %v1208_v17 = vsel %vm492_vm0, %v1203_v49, 0 }
 0x177   : > { %v1252_v50 = vpop.permute.xlu0 %1251 }
 0x178   : > { %3872 = vmatmul.mubr.msk.bf16.vlgmr.msra.gmra.mrb[16].mxu1 %vm492_vm0, %v632_v36  ;;  %3896 = vmatmul.mubr.msk.bf16.vlgmr.msra.gmra.mrb[12].mxu0 %vm492_vm0, %v636_v37  ;;  %v1257_v55 = vsel %vm492_vm0, %v1252_v50, 0 }
 0x179   : > { %3876 = vmatpush3.bf16.xpose.msra.mxu1 %v816_v29  ;;  %3906 = vmatpush3.bf16.xpose.msra.mxu0 %v1061_v38  ;;  %v1301_v56 = vpop.permute.xlu1 %1300 }
 0x17a   : > { %3907 = vmatprep.mubr.msk.bf16.mxu0 %vm4324_vm1, %v4323_v26  ;;  %3877 = vmatprep.mubr.msk.bf16.mxu1 %vm4324_vm1, %v4323_v26  ;;  %v1306_v19 = vsel %vm492_vm0, %v1301_v56, 0 }
 0x17b   : > { %3887 = vmatprep.subr.bf16.mxu1 %v4323_v26  ;;  %3917 = vmatprep.subr.bf16.mxu0 %v4323_v26  ;;  %v1350_v59 = vpop.permute.xlu0 %1349 }
 0x17c   : > { %v1355_v63 = vsel %vm492_vm0, %v1350_v59, 0 }
 0x17d   : > { %v1399_v12 = vpop.permute.xlu1 %1398 }
 0x17e   : > { %v1404_v21 = vsel %vm492_vm0, %v1399_v12, 0 }
 0x17f   : > { %v1689_v23 = vpop.permute.xlu0 %1688 }
 0x180   : > { %3878 = vmatmul.mubr.msk.bf16.vlgmr.msra.gmra.mrb[20].mxu1 %vm492_vm0, %v633_v44  ;;  %3908 = vmatmul.mubr.msk.bf16.vlgmr.msra.gmra.mrb[16].mxu0 %vm492_vm0, %v638_v45  ;;  %v1694_v25 = vsel %vm1644_vm2, %v1689_v23, 0 }
 0x181   : > { %3888 = vmatpush3.bf16.xpose.msra.mxu1 %v914_v33  ;;  %3918 = vmatpush3.bf16.xpose.msra.mxu0 %v1159_v46  ;;  %v1640_v14 = vpop.permute.xlu1 %1639 }
 0x182   : > { %3919 = vmatprep.mubr.msk.bf16.mxu0 %vm4324_vm1, %v4323_v26  ;;  %3889 = vmatprep.mubr.msk.bf16.mxu1 %vm4324_vm1, %v4323_v26  ;;  %v1646_v61 = vsel %vm1644_vm2, %v1640_v14, 0 }
 0x183   : > { %3899 = vmatprep.subr.bf16.mxu1 %v4323_v26  ;;  %3929 = vmatprep.subr.bf16.mxu0 %v4323_v26 }
 0x188   : > { %3890 = vmatmul.mubr.msk.bf16.vlgmr.msra.gmra.mrb[24].mxu1 %vm492_vm0, %v635_v51  ;;  %3920 = vmatmul.mubr.msk.bf16.vlgmr.msra.gmra.mrb[20].mxu0 %vm492_vm0, %v640_v54 }
 0x189   : > { %3900 = vmatpush3.bf16.xpose.msra.mxu1 %v1012_v53  ;;  %3930 = vmatpush3.bf16.xpose.msra.mxu0 %v1257_v55 }
 0x18a   : > { %3901 = vmatprep.mubr.msk.bf16.mxu1 %vm4324_vm1, %v4323_v26  ;;  %3931 = vmatprep.mubr.msk.bf16.mxu0 %vm4324_vm1, %v4323_v26 }
 0x18b   : > { %3911 = vmatprep.subr.bf16.mxu1 %v4323_v26  ;;  %3941 = vmatprep.subr.bf16.mxu0 %v4323_v26 }
 0x190   : > { %3902 = vmatmul.mubr.msk.bf16.vlgmr.msra.gmra.mrb[28].mxu1 %vm492_vm0, %v637_v60  ;;  %3932 = vmatmul.mubr.msk.bf16.vlgmr.msra.gmra.mrb[24].mxu0 %vm492_vm0, %v642_v62 }
 0x191   : > { %3912 = vmatpush3.bf16.xpose.msra.mxu1 %v1110_v52  ;;  %3942 = vmatpush3.bf16.xpose.msra.mxu0 %v1355_v63 }
 0x192   : > { %3913 = vmatprep.mubr.msk.bf16.mxu1 %vm4324_vm1, %v4323_v26  ;;  %3943 = vmatprep.mubr.msk.bf16.mxu0 %vm4324_vm1, %v4323_v26 }
 0x193   : > { %3923 = vmatprep.subr.bf16.mxu1 %v4323_v26  ;;  %3953 = vmatprep.subr.bf16.mxu0 %v4323_v26 }
 0x198   : > { %3914 = vmatmul.mubr.msk.bf16.vlgmr.msra.gmra.mrb[32].mxu1 %vm492_vm0, %v639_v15  ;;  %3944 = vmatmul.mubr.msk.bf16.vlgmr.msra.gmra.mrb[28].mxu0 %vm492_vm0, %v644_v16 }
 0x199   : > { %3924 = vmatpush3.bf16.xpose.msra.mxu1 %v1208_v17  ;;  %3954 = vmatpush3.bf16.msra.mxu0 %v1646_v61 }
 0x19a   : > { %3925 = vmatprep.mubr.msk.bf16.mxu1 %vm4324_vm1, %v4323_v26  ;;  %3935 = vmatprep.subr.bf16.mxu1 %v4323_v26 }
 0x19b   : > { %3955 = vmatprep.mubr.msk.bf16.mxu0 %vm4324_vm1, %v4323_v26  ;;  %3965 = vmatprep.subr.bf16.mxu0 %v4323_v26 }
 0x1a0   : > { %3926 = vmatmul.mubr.msk.bf16.vlgmr.msra.gmra.mrb[36].mxu1 %vm492_vm0, %v641_v18 }
 0x1a1   : > { %3936 = vmatpush3.bf16.xpose.msra.mxu1 %v1306_v19  ;;  %3937 = vmatprep.mubr.msk.bf16.mxu1 %vm4324_vm1, %v4323_v26 }
 0x1a2   : > { %3947 = vmatprep.subr.bf16.mxu1 %v4323_v26 }
 0x1a8   : > { %3938 = vmatmul.mubr.msk.bf16.vlgmr.msra.gmra.mrb[40].mxu1 %vm492_vm0, %v643_v20 }
 0x1a9   : > { %3948 = vmatpush3.bf16.xpose.msra.mxu1 %v1404_v21  ;;  %3949 = vmatprep.mubr.msk.bf16.mxu1 %vm4324_vm1, %v4323_v26 }
 0x1aa   : > { %3959 = vmatprep.subr.bf16.mxu1 %v4323_v26 }
 0x1b0   : > { %3950 = vmatmul.mubr.msk.bf16.vlgmr.msra.gmra.mrb[44].mxu1 %vm492_vm0, %v645_v24 }
 0x1b1   : > { %3960 = vmatpush3.bf16.msra.mxu1 %v1694_v25  ;;  %3961 = vmatprep.mubr.msk.bf16.mxu1 %vm4324_vm1, %v4323_v26 }
 0x1b2   : > { %3971 = vmatprep.subr.bf16.mxu1 %v4323_v26 }
 0x23b   : > { %v4664_v5 = vpop.f32.mrb[8].mxu1 }
 0x23c   : > { %v3861_v27 = vpop.f32.mrb[9].mxu1  ;;  %v1447_v8 = vsel %vm1446_vm3, %v4664_v5, -inf }
 0x23d   : > { %1448 = vmax.xlane.f32.xlu0 %v1447_v8  ;;  %v708_v28 = vpop.f32.mrb[10].mxu1 }
 0x23e   : > { %v3862_v30 = vpop.f32.mrb[11].mxu1 }
 0x243   : > { %v4668_v31 = vpop.f32.mrb[12].mxu1  ;;  %v4670_v32 = vpop.f32.mrb[8].mxu0 }
 0x244   : > { %v3867_v34 = vpop.f32.mrb[13].mxu1  ;;  %v3885_v35 = vpop.f32.mrb[9].mxu0  ;;  %v1450_v36 = vsel %vm1446_vm3, %v4668_v31, -inf  ;;  %v1459_v40 = vsel %vm1446_vm3, %v4670_v32, -inf }
 0x245   : > { %v904_v37 = vpop.f32.mrb[10].mxu0  ;;  %1451 = vmax.xlane.f32.xlu1 %v1450_v36  ;;  %v757_v38 = vpop.f32.mrb[14].mxu1 }
 0x246   : > { %v3868_v39 = vpop.f32.mrb[15].mxu1  ;;  %v3886_v29 = vpop.f32.mrb[11].mxu0 }
 0x249   : > { %1460 = vmax.xlane.f32.xlu1 %v1459_v40 }
 0x24b   : > { %v4676_v41 = vpop.f32.mrb[16].mxu1  ;;  %v4678_v42 = vpop.f32.mrb[12].mxu0 }
 0x24c   : > { %v3873_v43 = vpop.f32.mrb[17].mxu1  ;;  %v3897_v44 = vpop.f32.mrb[13].mxu0  ;;  %v1465_v45 = vsel %vm1446_vm3, %v4678_v42, -inf  ;;  %v1453_v46 = vsel %vm1446_vm3, %v4676_v41, -inf }
 0x24d   : > { %v1002_v33 = vpop.f32.mrb[14].mxu0  ;;  %1466 = vmax.xlane.f32.xlu1 %v1465_v45  ;;  %1454 = vmax.xlane.f32.xlu0 %v1453_v46  ;;  %v806_v47 = vpop.f32.mrb[18].mxu1 }
 0x24e   : > { %v3874_v48 = vpop.f32.mrb[19].mxu1  ;;  %v3898_v49 = vpop.f32.mrb[15].mxu0 }
 0x253   : > { %v4684_v50 = vpop.f32.mrb[20].mxu1  ;;  %v4686_v51 = vpop.f32.mrb[16].mxu0 }
 0x254   : > { %v3879_v54 = vpop.f32.mrb[21].mxu1  ;;  %v3909_v55 = vpop.f32.mrb[17].mxu0  ;;  %v1471_v53 = vsel %vm1446_vm3, %v4686_v51, -inf  ;;  %v1456_v56 = vsel %vm1446_vm3, %v4684_v50, -inf }
 0x255   : > { %v1100_v57 = vpop.f32.mrb[18].mxu0  ;;  %1472 = vmax.xlane.f32.xlu1 %v1471_v53  ;;  %1457 = vmax.xlane.f32.xlu0 %v1456_v56  ;;  %v855_v58 = vpop.f32.mrb[22].mxu1 }
 0x256   : > { %v3880_v59 = vpop.f32.mrb[23].mxu1  ;;  %v3910_v60 = vpop.f32.mrb[19].mxu0 }
 0x257   : > { %v4732_v57 = vpop.permute.xlu0 %1784  ;;  %v4734_v58 = vpop.permute.xlu1 %1736 }
 0x25b   : > { %v4692_v62 = vpop.f32.mrb[24].mxu1  ;;  %v4694_v63 = vpop.f32.mrb[20].mxu0 }
 0x25c   : > { %v3891_v12 = vpop.f32.mrb[25].mxu1  ;;  %v3921_v52 = vpop.f32.mrb[21].mxu0  ;;  %v1477_v3 = vsel %vm1446_vm3, %v4694_v63, -inf  ;;  %v1462_v13 = vsel %vm1446_vm3, %v4692_v62, -inf }
 0x25d   : > { %v1198_v14 = vpop.f32.mrb[22].mxu0  ;;  %1478 = vmax.xlane.f32.xlu1 %v1477_v3  ;;  %1463 = vmax.xlane.f32.xlu0 %v1462_v13  ;;  %v953_v15 = vpop.f32.mrb[26].mxu1 }
 0x25e   : > { %v3892_v16 = vpop.f32.mrb[27].mxu1  ;;  %v3922_v17 = vpop.f32.mrb[23].mxu0 }
 0x25f   : > { %v4736_v59 = vpop.permute.xlu0 %1976 }
 0x263   : > { %v4700_v61 = vpop.f32.mrb[28].mxu1  ;;  %v4702_v6 = vpop.f32.mrb[24].mxu0 }
 0x264   : > { %v3903_v18 = vpop.f32.mrb[29].mxu1  ;;  %v3933_v19 = vpop.f32.mrb[25].mxu0  ;;  %v1483_v0 = vsel %vm1446_vm3, %v4702_v6, -inf  ;;  %v1468_v20 = vsel %vm1446_vm3, %v4700_v61, -inf }
 0x265   : > { %v1296_v21 = vpop.f32.mrb[26].mxu0  ;;  %1484 = vmax.xlane.f32.xlu1 %v1483_v0  ;;  %1469 = vmax.xlane.f32.xlu0 %v1468_v20  ;;  %v1051_v22 = vpop.f32.mrb[30].mxu1 }
 0x266   : > { %v3904_v23 = vpop.f32.mrb[31].mxu1  ;;  %v3934_v24 = vpop.f32.mrb[27].mxu0 }
 0x267   : > { %v4740_v60 = vpop.permute.xlu0 %1880 }
 0x26b   : > { %v4708_v25 = vpop.f32.mrb[32].mxu1  ;;  %v4710_v27 = vpop.f32.mrb[28].mxu0 }
 0x26c   : > { %v3915_v8 = vpop.f32.mrb[33].mxu1  ;;  %v3945_v28 = vpop.f32.mrb[29].mxu0  ;;  %v1489_v30 = vsel %vm1446_vm3, %v4710_v27, -inf  ;;  %v1474_v34 = vsel %vm1446_vm3, %v4708_v25, -inf }
 0x26d   : > { %v1394_v35 = vpop.f32.mrb[30].mxu0  ;;  %1490 = vmax.xlane.f32.xlu1 %v1489_v30  ;;  %1475 = vmax.xlane.f32.xlu0 %v1474_v34  ;;  %v1149_v36 = vpop.f32.mrb[34].mxu1 }
 0x26e   : > { %v3916_v37 = vpop.f32.mrb[35].mxu1  ;;  %v3946_v38 = vpop.f32.mrb[31].mxu0 }
 0x273   : > { %v4716_v39 = vpop.f32.mrb[36].mxu1 }
 0x274   : > { %v3927_v29 = vpop.f32.mrb[37].mxu1  ;;  %v1480_v40 = vsel %vm1446_vm3, %v4716_v39, -inf }
 0x275   : > { %1481 = vmax.xlane.f32.xlu0 %v1480_v40  ;;  %v1247_v43 = vpop.f32.mrb[38].mxu1 }
 0x276   : > { %v3928_v44 = vpop.f32.mrb[39].mxu1 }
 0x27b   : > { %v4720_v45 = vpop.f32.mrb[40].mxu1 }
 0x27c   : > { %v3939_v46 = vpop.f32.mrb[41].mxu1  ;;  %v1486_v33 = vsel %vm1446_vm3, %v4720_v45, -inf }
 0x27d   : > { %1487 = vmax.xlane.f32.xlu0 %v1486_v33  ;;  %v1345_v47 = vpop.f32.mrb[42].mxu1 }
 0x27e   : > { %2120 = vrot.lane.b32.xlu1 %v4510_v2, %s4326_s22  ;;  %v3940_v48 = vpop.f32.mrb[43].mxu1  ;;  %v4738_v2 = vpop.permute.xlu1 %1832 }
 0x282   : > { %v4742_v12 = vpop.permute.xlu1 %1928 }
 0x283   : > { %v4726_v49 = vpop.f32.mrb[44].mxu1 }
 0x284   : > { %v3951_v54 = vpop.f32.mrb[45].mxu1  ;;  %v1492_v55 = vsel %vm1446_vm3, %v4726_v49, -inf }
 0x285   : > { %1493 = vmax.xlane.f32.xlu0 %v1492_v55  ;;  %v1443_v53 = vpop.f32.mrb[46].mxu1 }
 0x286   : > { %v3952_v56 = vpop.f32.mrb[47].mxu1  ;;  %v4745_v14 = vpop.permute.xlu1 %2024 }
 0x29b   : > { %2072 = vrot.lane.b32.xlu0 %v4505_v1, %s4326_s22 }
 0x2ca   : > { %v1449_v52 = vpop.xlane.xlu0 %1448 }
 0x2cb   : > { %v1495_v3 = vsub.f32 %v4664_v5, %v1449_v52 }
 0x2cd   : > { %v1511_v13 = vmul.f32 1.442695, %v1495_v3 }
 0x2cf   : > { %4139 = vpow2.f32 %v1511_v13 }
 0x2d2   : > { %v1452_v1 = vpop.xlane.xlu1 %1451 }
 0x2d3   : > { %v1496_v15 = vsub.f32 %v4668_v31, %v1452_v1 }
 0x2d5   : > { %v1513_v16 = vmul.f32 1.442695, %v1496_v15 }
 0x2d6   : > { %v1461_v17 = vpop.xlane.xlu1 %1460 }
 0x2d7   : > { %4141 = vpow2.f32 %v1513_v16  ;;  %v1499_v18 = vsub.f32 %v4670_v32, %v1461_v17 }
 0x2d9   : > { %v4749_v19 = vpop.eup %4139  ;;  %v1519_v0 = vmul.f32 1.442695, %v1499_v18 }
 0x2da   : > { %v1455_v20 = vpop.xlane.xlu0 %1454  ;;  %v1543_v21 = vsel %vm1446_vm3, %v4749_v19, 0.0 }
 0x2db   : > { %4143 = vpow2.f32 %v1519_v0  ;;  %v1497_v5 = vsub.f32 %v4676_v41, %v1455_v20  ;;  %1544 = vadd.xlane.f32.xlu1 %v1543_v21 }
 0x2dd   : > { %v1515_v22 = vmul.f32 1.442695, %v1497_v5 }
 0x2df   : > { %4145 = vpow2.f32 %v1515_v22 }
 0x2e1   : > { %v4754_v23 = vpop.eup %4141 }
 0x2e2   : > { %v1458_v31 = vpop.xlane.xlu0 %1457  ;;  %v1546_v24 = vsel %vm1446_vm3, %v4754_v23, 0.0 }
 0x2e3   : > { %v1498_v32 = vsub.f32 %v4684_v50, %v1458_v31  ;;  %1547 = vadd.xlane.f32.xlu0 %v1546_v24 }
 0x2e5   : > { %v4759_v8 = vpop.eup %4143  ;;  %v1517_v28 = vmul.f32 1.442695, %v1498_v32 }
 0x2e6   : > { %v1555_v30 = vsel %vm1446_vm3, %v4759_v8, 0.0 }
 0x2e7   : > { %1556 = vadd.xlane.f32.xlu1 %v1555_v30  ;;  %4147 = vpow2.f32 %v1517_v28 }
 0x2e9   : > { %v4763_v41 = vpop.eup %4145 }
 0x2ea   : > { %v1464_v34 = vpop.xlane.xlu0 %1463  ;;  %v1549_v36 = vsel %vm1446_vm3, %v4763_v41, 0.0 }
 0x2eb   : > { %v1500_v35 = vsub.f32 %v4692_v62, %v1464_v34  ;;  %1550 = vadd.xlane.f32.xlu1 %v1549_v36 }
 0x2ed   : > { %v1521_v37 = vmul.f32 1.442695, %v1500_v35 }
 0x2ef   : > { %4149 = vpow2.f32 %v1521_v37 }
 0x2f1   : > { %v4768_v50 = vpop.eup %4147 }
 0x2f2   : > { %v1470_v38 = vpop.xlane.xlu0 %1469  ;;  %v1552_v40 = vsel %vm1446_vm3, %v4768_v50, 0.0 }
 0x2f3   : > { %v1502_v29 = vsub.f32 %v4700_v61, %v1470_v38  ;;  %1553 = vadd.xlane.f32.xlu0 %v1552_v40 }
 0x2f5   : > { %v1525_v43 = vmul.f32 1.442695, %v1502_v29 }
 0x2f7   : > { %4151 = vpow2.f32 %v1525_v43 }
 0x2f9   : > { %v4773_v44 = vpop.eup %4149 }
 0x2fa   : > { %v1476_v62 = vpop.xlane.xlu0 %1475  ;;  %v1558_v33 = vsel %vm1446_vm3, %v4773_v44, 0.0 }
 0x2fb   : > { %v1504_v46 = vsub.f32 %v4708_v25, %v1476_v62  ;;  %1559 = vadd.xlane.f32.xlu0 %v1558_v33  ;;  %v1467_v25 = vpop.xlane.xlu1 %1466 }
 0x2fc   : > { %2168 = vrot.lane.b32.xlu1 %v4517_v4, %s4326_s22  ;;  %v1501_v52 = vsub.f32 %v4678_v42, %v1467_v25 }
 0x2fd   : > { %v1529_v47 = vmul.f32 1.442695, %v1504_v46 }
 0x2fe   : > { %v1523_v13 = vmul.f32 1.442695, %v1501_v52 }
 0x2ff   : > { %4153 = vpow2.f32 %v1529_v47  ;;  %v1473_v3 = vpop.xlane.xlu1 %1472 }
 0x300   : > { %v1503_v1 = vsub.f32 %v4686_v51, %v1473_v3 }
 0x301   : > { %v4780_v61 = vpop.eup %4151 }
 0x302   : > { %v1482_v48 = vpop.xlane.xlu0 %1481  ;;  %v1564_v55 = vsel %vm1446_vm3, %v4780_v61, 0.0  ;;  %v1527_v17 = vmul.f32 1.442695, %v1503_v1 }
 0x303   : > { %v1506_v54 = vsub.f32 %v4716_v39, %v1482_v48  ;;  %1565 = vadd.xlane.f32.xlu0 %v1564_v55  ;;  %v1479_v39 = vpop.xlane.xlu1 %1478 }
 0x304   : > { %v1505_v18 = vsub.f32 %v4694_v63, %v1479_v39  ;;  %v1838_v39 = vsel %vm1644_vm2, %v4738_v2, 0  ;;  %v1886_v2 = vsel %vm1644_vm2, %v4740_v60, 0 }
 0x305   : > { %v1533_v53 = vmul.f32 1.442695, %v1506_v54 }
 0x306   : > { %v1531_v0 = vmul.f32 1.442695, %v1505_v18 }
 0x307   : > { %4155 = vpow2.f32 %v1533_v53  ;;  %v1485_v42 = vpop.xlane.xlu1 %1484  ;;  %v1742_v53 = vsel %vm1644_vm2, %v4734_v58, 0 }
 0x308   : > { %4157 = vpow2.f32 %v1523_v13  ;;  %v1507_v20 = vsub.f32 %v4702_v6, %v1485_v42 }
 0x309   : > { %v4785_v56 = vpop.eup %4153  ;;  %4159 = vpow2.f32 %v1527_v17 }
 0x30a   : > { %v1570_v4 = vsel %vm1446_vm3, %v4785_v56, 0.0  ;;  %4161 = vpow2.f32 %v1531_v0  ;;  %v1535_v5 = vmul.f32 1.442695, %v1507_v20  ;;  %v1488_v35 = vpop.xlane.xlu0 %1487  ;;  %v1934_v0 = vsel %vm1644_vm2, %v4742_v12, 0 }
 0x30b   : > { %1571 = vadd.xlane.f32.xlu0 %v1570_v4  ;;  %v1491_v21 = vpop.xlane.xlu1 %1490  ;;  %v1508_v37 = vsub.f32 %v4720_v45, %v1488_v35  ;;  %v1790_v4 = vsel %vm1644_vm2, %v4732_v57, 0 }
 0x30c   : > { %v1509_v51 = vsub.f32 %v4710_v27, %v1491_v21  ;;  %4163 = vpow2.f32 %v1535_v5 }
 0x30d   : > { %v1537_v29 = vmul.f32 1.442695, %v1508_v37 }
 0x30e   : > { %v1539_v31 = vmul.f32 1.442695, %v1509_v51 }
 0x310   : > { %4165 = vpow2.f32 %v1539_v31 }
 0x311   : > { %v4791_v15 = vpop.eup %4155  ;;  %4167 = vpow2.f32 %v1537_v29 }
 0x312   : > { %v1576_v16 = vsel %vm1446_vm3, %v4791_v15, 0.0  ;;  %v4798_v22 = vpop.eup %4157  ;;  %v1494_v38 = vpop.xlane.xlu0 %1493 }
 0x313   : > { %1577 = vadd.xlane.f32.xlu0 %v1576_v16  ;;  %v1561_v24 = vsel %vm1446_vm3, %v4798_v22, 0.0  ;;  %v4802_v32 = vpop.eup %4159  ;;  %v1510_v40 = vsub.f32 %v4726_v49, %v1494_v38  ;;  %v4836_v49 = vpop.permute.xlu1 %2120 }
 0x314   : > { %v1567_v63 = vsel %vm1446_vm3, %v4802_v32, 0.0  ;;  %v4806_v6 = vpop.eup %4161 }
 0x315   : > { %v1573_v27 = vsel %vm1446_vm3, %v4806_v6, 0.0  ;;  %v1541_v43 = vmul.f32 1.442695, %v1510_v40 }
 0x316   : > { %v4810_v28 = vpop.eup %4163  ;;  %v4838_v33 = vpop.permute.xlu0 %2072 }
 0x317   : > { %v1579_v30 = vsel %vm1446_vm3, %v4810_v28, 0.0  ;;  %4169 = vpow2.f32 %v1541_v43 }
 0x31a   : > { %v4816_v34 = vpop.eup %4165 }
 0x31b   : > { %v1585_v36 = vsel %vm1446_vm3, %v4816_v34, 0.0 }
 0x320   : > { %1562 = vadd.xlane.f32.xlu1 %v1561_v24 }
 0x324   : > { %1568 = vadd.xlane.f32.xlu1 %v1567_v63 }
 0x328   : > { %1574 = vadd.xlane.f32.xlu1 %v1573_v27 }
 0x329   : > { %2216 = vrot.lane.b32.xlu0 %v4527_v7, %s4326_s22  ;;  %v4824_v7 = vpop.eup %4167 }
 0x32a   : > { %v1582_v62 = vsel %vm1446_vm3, %v4824_v7, 0.0  ;;  %v4830_v46 = vpop.eup %4169 }
 0x32b   : > { %v1588_v45 = vsel %vm1446_vm3, %v4830_v46, 0.0 }
 0x32c   : > { %1580 = vadd.xlane.f32.xlu1 %v1579_v30 }
 0x330   : > { %1586 = vadd.xlane.f32.xlu1 %v1585_v36 }
 0x341   : > { %2264 = vrot.lane.b32.xlu1 %v4535_v9, %s4326_s22 }
 0x345   : > { %2360 = vrot.lane.b32.xlu1 %v4547_v11, %s4326_s22 }
 0x348   : > { %1583 = vadd.xlane.f32.xlu0 %v1582_v62 }
 0x34c   : > { %1589 = vadd.xlane.f32.xlu0 %v1588_v45 }
 0x362   : > { %2312 = vrot.lane.b32.xlu0 %v4541_v10, %s4326_s22 }
 0x368   : > { %v1545_v9 = vpop.xlane.xlu1 %1544 }
 0x369   : > { %4171 = vrcp.f32 %v1545_v9 }
 0x370   : > { %v1548_v11 = vpop.xlane.xlu0 %1547 }
 0x371   : > { %4173 = vrcp.f32 %v1548_v11 }
 0x373   : > { %v4172_v47 = vpop.eup %4171 }
 0x374   : > { %v1607_v48 = vmul.f32 %v4172_v47, %v4749_v19  ;;  %v1557_v54 = vpop.xlane.xlu1 %1556 }
 0x376   : > { %v1623_v55 = vpack.c.bf16 %v1607_v48, %v1607_v48 }
 0x378   : > { %3956 = vmatmul.mubr.msk.bf16.vlgmr.msra.gmra.mrb[32].mxu0 %vm1446_vm3, %v1623_v55  ;;  %v1551_v10 = vpop.xlane.xlu1 %1550 }
 0x379   : > { %3966 = vmatpush3.bf16.msra.mxu0 %v1742_v53  ;;  %3967 = vmatprep.mubr.msk.bf16.mxu0 %vm4324_vm1, %v4323_v26  ;;  %4175 = vrcp.f32 %v1551_v10 }
 0x37a   : > { %3977 = vmatprep.subr.bf16.mxu0 %v4323_v26  ;;  %4177 = vrcp.f32 %v1557_v54 }
 0x37b   : > { %v4174_v25 = vpop.eup %4173 }
 0x37c   : > { %v1608_v52 = vmul.f32 %v4174_v25, %v4754_v23  ;;  %v2169_v27 = vpop.permute.xlu1 %2168 }
 0x37e   : > { %v1624_v19 = vpack.c.bf16 %v1608_v52, %v1608_v52 }
 0x380   : > { %3962 = vmatmul.mubr.msk.bf16.vlgmr.msra.gmra.mrb[48].mxu1 %vm1446_vm3, %v1624_v19  ;;  %v1554_v58 = vpop.xlane.xlu0 %1553 }
 0x381   : > { %3972 = vmatpush3.bf16.msra.mxu1 %v1790_v4  ;;  %3973 = vmatprep.mubr.msk.bf16.mxu1 %vm4324_vm1, %v4323_v26  ;;  %4179 = vrcp.f32 %v1554_v58 }
 0x382   : > { %3983 = vmatprep.subr.bf16.mxu1 %v4323_v26 }
 0x383   : > { %v4176_v3 = vpop.eup %4175 }
 0x384   : > { %v1609_v13 = vmul.f32 %v4176_v3, %v4763_v41  ;;  %v4178_v23 = vpop.eup %4177 }
 0x385   : > { %v1611_v16 = vmul.f32 %v4178_v23, %v4759_v8 }
 0x386   : > { %v1625_v1 = vpack.c.bf16 %v1609_v13, %v1609_v13 }
 0x387   : > { %v1627_v42 = vpack.c.bf16 %v1611_v16, %v1611_v16 }
 0x388   : > { %3968 = vmatmul.mubr.msk.bf16.vlgmr.msra.gmra.mrb[36].mxu0 %vm1446_vm3, %v1625_v1  ;;  %v1560_v57 = vpop.xlane.xlu0 %1559 }
 0x389   : > { %3978 = vmatpush3.bf16.msra.mxu0 %v1838_v39  ;;  %4181 = vrcp.f32 %v1560_v57  ;;  %3979 = vmatprep.mubr.msk.bf16.mxu0 %vm4324_vm1, %v4323_v26  ;;  %v4132_v39 = vld [vmem:[%s5649_s3 + $0x8] sm:$0xff]  }
 0x38a   : > { %3989 = vmatprep.subr.bf16.mxu0 %v4323_v26 }
 0x38b   : > { %v4180_v17 = vpop.eup %4179 }
 0x38c   : > { %v1610_v41 = vmul.f32 %v4180_v17, %v4768_v50  ;;  %v1982_v50 = vsel %vm1644_vm2, %v4736_v59, 0 }
 0x38e   : > { %v1626_v18 = vpack.c.bf16 %v1610_v41, %v1610_v41 }
 0x390   : > { %3974 = vmatmul.mubr.msk.bf16.vlgmr.msra.gmra.mrb[52].mxu1 %vm1446_vm3, %v1626_v18  ;;  %3980 = vmatmul.mubr.msk.bf16.vlgmr.msra.gmra.mrb[40].mxu0 %vm1446_vm3, %v1627_v42  ;;  %v1566_v20 = vpop.xlane.xlu0 %1565 }
 0x391   : > { %3984 = vmatpush3.bf16.msra.mxu1 %v1886_v2  ;;  %3990 = vmatpush3.bf16.msra.mxu0 %v1934_v0  ;;  %4183 = vrcp.f32 %v1566_v20 }
 0x392   : > { %3985 = vmatprep.mubr.msk.bf16.mxu1 %vm4324_vm1, %v4323_v26  ;;  %3995 = vmatprep.subr.bf16.mxu1 %v4323_v26 }
 0x393   : > { %v4182_v8 = vpop.eup %4181  ;;  %3991 = vmatprep.mubr.msk.bf16.mxu0 %vm4324_vm1, %v4323_v26  ;;  %4001 = vmatprep.subr.bf16.mxu0 %v4323_v26 }
 0x394   : > { %v1612_v60 = vmul.f32 %v4182_v8, %v4773_v44  ;;  %v2078_v44 = vsel %vm1644_vm2, %v4838_v33, 0 }
 0x396   : > { %v1628_v12 = vpack.c.bf16 %v1612_v60, %v1612_v60 }
 0x398   : > { %3986 = vmatmul.mubr.msk.bf16.vlgmr.msra.gmra.mrb[56].mxu1 %vm1446_vm3, %v1628_v12  ;;  %v1572_v21 = vpop.xlane.xlu0 %1571 }
 0x399   : > { %3996 = vmatpush3.bf16.msra.mxu1 %v1982_v50  ;;  %4185 = vrcp.f32 %v1572_v21  ;;  %3997 = vmatprep.mubr.msk.bf16.mxu1 %vm4324_vm1, %v4323_v26 }
 0x39a   : > { %4007 = vmatprep.subr.bf16.mxu1 %v4323_v26 }
 0x39b   : > { %v4184_v5 = vpop.eup %4183 }
 0x39c   : > { %v1614_v51 = vmul.f32 %v4184_v5, %v4780_v61  ;;  %v2174_v61 = vsel %vm1644_vm2, %v2169_v27, 0 }
 0x39e   : > { %v1630_v31 = vpack.c.bf16 %v1614_v51, %v1614_v51 }
 0x3a0   : > { %v1578_v24 = vpop.xlane.xlu0 %1577  ;;  %3998 = vmatmul.mubr.msk.bf16.vlgmr.msra.gmra.mrb[60].mxu1 %vm1446_vm3, %v1630_v31 }
 0x3a1   : > { %4187 = vrcp.f32 %v1578_v24  ;;  %4008 = vmatpush3.bf16.msra.mxu1 %v2078_v44  ;;  %4009 = vmatprep.mubr.msk.bf16.mxu1 %vm4324_vm1, %v4323_v26 }
 0x3a2   : > { %4019 = vmatprep.subr.bf16.mxu1 %v4323_v26 }
 0x3a3   : > { %v4186_v59 = vpop.eup %4185 }
 0x3a4   : > { %v1616_v63 = vmul.f32 %v4186_v59, %v4785_v56  ;;  %v2217_v55 = vpop.permute.xlu0 %2216 }
 0x3a5   : > { %v2222_v25 = vsel %vm1644_vm2, %v2217_v55, 0 }
 0x3a6   : > { %v1632_v30 = vpack.c.bf16 %v1616_v63, %v1616_v63 }
 0x3a8   : > { %4010 = vmatmul.mubr.msk.bf16.vlgmr.msra.gmra.mrb[64].mxu1 %vm1446_vm3, %v1632_v30 }
 0x3a9   : > { %4020 = vmatpush3.bf16.msra.mxu1 %v2174_v61  ;;  %4021 = vmatprep.mubr.msk.bf16.mxu1 %vm4324_vm1, %v4323_v26 }
 0x3aa   : > { %4031 = vmatprep.subr.bf16.mxu1 %v4323_v26 }
 0x3ab   : > { %v4188_v35 = vpop.eup %4187 }
 0x3ac   : > { %v1618_v36 = vmul.f32 %v4188_v35, %v4791_v15  ;;  %v2030_v15 = vsel %vm1644_vm2, %v4745_v14, 0  ;;  %v2126_v14 = vsel %vm1644_vm2, %v4836_v49, 0 }
 0x3ad   : > { %v1563_v37 = vpop.xlane.xlu1 %1562 }
 0x3ae   : > { %v1634_v38 = vpack.c.bf16 %v1618_v36, %v1618_v36  ;;  %4189 = vrcp.f32 %v1563_v37 }
 0x3b0   : > { %4022 = vmatmul.mubr.msk.bf16.vlgmr.msra.gmra.mrb[68].mxu1 %vm1446_vm3, %v1634_v38 }
 0x3b1   : > { %v1569_v56 = vpop.xlane.xlu1 %1568  ;;  %4033 = vmatprep.mubr.msk.bf16.mxu1 %vm4324_vm1, %v4323_v26 }
 0x3b2   : > { %4191 = vrcp.f32 %v1569_v56 }
 0x3b5   : > { %v1575_v29 = vpop.xlane.xlu1 %1574 }
 0x3b6   : > { %4193 = vrcp.f32 %v1575_v29 }
 0x3b8   : > { %v4190_v40 = vpop.eup %4189 }
 0x3b9   : > { %v1613_v43 = vmul.f32 %v4190_v40, %v4798_v22  ;;  %v1581_v62 = vpop.xlane.xlu1 %1580 }
 0x3ba   : > { %4195 = vrcp.f32 %v1581_v62 }
 0x3bb   : > { %v1629_v45 = vpack.c.bf16 %v1613_v43, %v1613_v43 }
 0x3bc   : > { %v4192_v9 = vpop.eup %4191 }
 0x3bd   : > { %3992 = vmatmul.mubr.msk.bf16.vlgmr.msra.gmra.mrb[44].mxu0 %vm1446_vm3, %v1629_v45  ;;  %v1587_v33 = vpop.xlane.xlu1 %1586  ;;  %v1615_v11 = vmul.f32 %v4192_v9, %v4802_v32 }
 0x3be   : > { %4002 = vmatpush3.bf16.msra.mxu0 %v2030_v15  ;;  %4003 = vmatprep.mubr.msk.bf16.mxu0 %vm4324_vm1, %v4323_v26  ;;  %4197 = vrcp.f32 %v1587_v33 }
 0x3bf   : > { %4013 = vmatprep.subr.bf16.mxu0 %v4323_v26  ;;  %v1631_v48 = vpack.c.bf16 %v1615_v11, %v1615_v11 }
 0x3c0   : > { %v4194_v54 = vpop.eup %4193 }
 0x3c1   : > { %v2265_v47 = vpop.permute.xlu1 %2264  ;;  %v1617_v32 = vmul.f32 %v4194_v54, %v4806_v6 }
 0x3c2   : > { %v2270_v22 = vsel %vm1644_vm2, %v2265_v47, 0 }
 0x3c3   : > { %4032 = vmatpush3.bf16.msra.mxu1 %v2270_v22  ;;  %v1633_v53 = vpack.c.bf16 %v1617_v32, %v1617_v32 }
 0x3c4   : > { %4043 = vmatprep.subr.bf16.mxu1 %v4323_v26  ;;  %v4196_v10 = vpop.eup %4195 }
 0x3c5   : > { %4004 = vmatmul.mubr.msk.bf16.vlgmr.msra.gmra.mrb[48].mxu0 %vm1446_vm3, %v1631_v48  ;;  %v1619_v49 = vmul.f32 %v4196_v10, %v4810_v28  ;;  %v4131_v28 = vld [vmem:[%s5649_s3] sm:$0xff]   ;;  %v2361_v16 = vpop.permute.xlu1 %2360 }
 0x3c6   : > { %4014 = vmatpush3.bf16.msra.mxu0 %v2126_v14  ;;  %4015 = vmatprep.mubr.msk.bf16.mxu0 %vm4324_vm1, %v4323_v26  ;;  %v2366_v41 = vsel %vm1644_vm2, %v2361_v16, 0 }
 0x3c7   : > { %4025 = vmatprep.subr.bf16.mxu0 %v4323_v26  ;;  %v1635_v52 = vpack.c.bf16 %v1619_v49, %v1619_v49 }
 0x3c8   : > { %v4198_v19 = vpop.eup %4197 }
 0x3c9   : > { %v1621_v58 = vmul.f32 %v4198_v19, %v4816_v34 }
 0x3cb   : > { %v1637_v23 = vpack.c.bf16 %v1621_v58, %v1621_v58 }
 0x3cd   : > { %4016 = vmatmul.mubr.msk.bf16.vlgmr.msra.gmra.mrb[52].mxu0 %vm1446_vm3, %v1633_v53 }
 0x3ce   : > { %4026 = vmatpush3.bf16.msra.mxu0 %v2222_v25  ;;  %4027 = vmatprep.mubr.msk.bf16.mxu0 %vm4324_vm1, %v4323_v26 }
 0x3cf   : > { %4037 = vmatprep.subr.bf16.mxu0 %v4323_v26 }
 0x3d5   : > { %v1584_v6 = vpop.xlane.xlu0 %1583  ;;  %4028 = vmatmul.mubr.msk.bf16.vlgmr.msra.gmra.mrb[56].mxu0 %vm1446_vm3, %v1635_v52 }
 0x3d6   : > { %4199 = vrcp.f32 %v1584_v6  ;;  %4039 = vmatprep.mubr.msk.bf16.mxu0 %vm4324_vm1, %v4323_v26 }
 0x3d9   : > { %v1590_v4 = vpop.xlane.xlu0 %1589 }
 0x3da   : > { %4201 = vrcp.f32 %v1590_v4 }
 0x3dd   : > { %v2313_v3 = vpop.permute.xlu0 %2312 }
 0x3de   : > { %v2318_v13 = vsel %vm1644_vm2, %v2313_v3, 0 }
 0x3df   : > { %4038 = vmatpush3.bf16.msra.mxu0 %v2318_v13 }
 0x3e0   : > { %v4200_v1 = vpop.eup %4199  ;;  %4049 = vmatprep.subr.bf16.mxu0 %v4131_v28 }
 0x3e1   : > { %v1620_v57 = vmul.f32 %v4200_v1, %v4824_v7 }
 0x3e2   : > { %4040 = vmatmul.mubr.msk.bf16.vlgmr.msra.gmra.mrb[60].mxu0 %vm1446_vm3, %v1637_v23 }
 0x3e3   : > { %v1636_v34 = vpack.c.bf16 %v1620_v57, %v1620_v57  ;;  %4050 = vmatpush3.bf16.msra.mxu0 %v4131_v28 }
 0x3e4   : > { %v4202_v17 = vpop.eup %4201  ;;  %4051 = vmatprep.subr.bf16.mxu0 %v4132_v39 }
 0x3e5   : > { %4034 = vmatmul.mubr.msk.bf16.vlgmr.msra.gmra.mrb[72].mxu1 %vm1446_vm3, %v1636_v34  ;;  %v1622_v18 = vmul.f32 %v4202_v17, %v4830_v46 }
 0x3e6   : > { %4044 = vmatpush3.bf16.msra.mxu1 %v2366_v41  ;;  %4045 = vmatprep.mubr.msk.bf16.mxu1 %vm4324_vm1, %v4323_v26 }
 0x3e7   : > { %4052 = vmatpush3.bf16.msra.mxu0 %v4132_v39  ;;  %v1638_v42 = vpack.c.bf16 %v1622_v18, %v1622_v18 }
 0x3ed   : > { %4046 = vmatmul.mubr.msk.bf16.vlgmr.msra.gmra.mrb[76].mxu1 %vm1446_vm3, %v1638_v42 }
 0x44b   : > { %v1682_v7 = vpop.f32.mrb[32].mxu0 }
 0x44c   : > { %v3957_v2 = vpop.f32.mrb[33].mxu0 }
 0x44d   : > { %v1685_v0 = vpop.f32.mrb[34].mxu0 }
 0x44e   : > { %v3958_v20 = vpop.f32.mrb[35].mxu0 }
 0x453   : > { %v1730_v8 = vpop.f32.mrb[48].mxu1 }
 0x454   : > { %v2408_v60 = vpack.c.bf16 %v1730_v8, %v1682_v7  ;;  %v3963_v12 = vpop.f32.mrb[49].mxu1 }
 0x455   : > { %v1733_v50 = vpop.f32.mrb[50].mxu1 }
 0x456   : > { %v3964_v21 = vpop.f32.mrb[51].mxu1  ;;  %4053 = vmatprep.mubr.msk.bf16.mxu0 %vm492_vm0, %v2408_v60 }
 0x457   : > { %v4952_v21 = vld [vmem:[%s5650_s4] ss:$0 sm:$0xff] }
 0x45b   : > { %v1778_v5 = vpop.f32.mrb[36].mxu0 }
 0x45c   : > { %v3969_v51 = vpop.f32.mrb[37].mxu0 }
 0x45d   : > { %v1781_v26 = vpop.f32.mrb[38].mxu0 }
 0x45e   : > { %v3970_v31 = vpop.f32.mrb[39].mxu0 }
 0x463   : > { %v1826_v46 = vpop.f32.mrb[52].mxu1  ;;  %v1874_v24 = vpop.f32.mrb[40].mxu0 }
 0x464   : > { %v2409_v44 = vpack.c.bf16 %v1826_v46, %v1778_v5  ;;  %v3975_v59 = vpop.f32.mrb[53].mxu1  ;;  %v3981_v63 = vpop.f32.mrb[41].mxu0 }
 0x465   : > { %v1829_v27 = vpop.f32.mrb[54].mxu1  ;;  %v1877_v30 = vpop.f32.mrb[42].mxu0  ;;  %v4299_v59 = vld [vmem:[%s4419_s18] sm:$0xff] }
 0x466   : > { %v3976_v61 = vpop.f32.mrb[55].mxu1  ;;  %v3982_v35 = vpop.f32.mrb[43].mxu0  ;;  %4054 = vmatmul.mubr.msk.bf16.vlgmr.msra.gmra.mrb[64].mxu0 %vm492_vm0, %v2409_v44 }
 0x467   : > { %v4300_v61 = vld [vmem:[%s4419_s18 + $0x8] sm:$0xff] }
 0x46b   : > { %v1922_v36 = vpop.f32.mrb[56].mxu1 }
 0x46c   : > { %v2410_v37 = vpack.c.bf16 %v1922_v36, %v1874_v24  ;;  %v3987_v38 = vpop.f32.mrb[57].mxu1  ;;  %v4301_v36 = vld [vmem:[%s4419_s18 + $0x10] sm:$0xff] }
 0x46d   : > { %v1925_v56 = vpop.f32.mrb[58].mxu1 }
 0x46e   : > { %v3988_v29 = vpop.f32.mrb[59].mxu1  ;;  %4057 = vmatprep.mubr.msk.bf16.mxu0 %vm492_vm0, %v2410_v37 }
 0x46f   : > { %v4302_v29 = vld [vmem:[%s4419_s18 + $0x18] sm:$0xff] }
 0x473   : > { %v2018_v40 = vpop.f32.mrb[60].mxu1 }
 0x474   : > { %v3999_v43 = vpop.f32.mrb[61].mxu1 }
 0x475   : > { %v2021_v62 = vpop.f32.mrb[62].mxu1 }
 0x476   : > { %v4000_v45 = vpop.f32.mrb[63].mxu1 }
 0x47b   : > { %v2114_v9 = vpop.f32.mrb[64].mxu1 }
 0x47c   : > { %v4011_v15 = vpop.f32.mrb[65].mxu1 }
 0x47d   : > { %v2117_v33 = vpop.f32.mrb[66].mxu1 }
 0x47e   : > { %v4012_v11 = vpop.f32.mrb[67].mxu1 }
 0x483   : > { %v2210_v47 = vpop.f32.mrb[68].mxu1 }
 0x484   : > { %v4023_v22 = vpop.f32.mrb[69].mxu1 }
 0x485   : > { %v2213_v48 = vpop.f32.mrb[70].mxu1 }
 0x486   : > { %v4024_v54 = vpop.f32.mrb[71].mxu1  ;;  %v4303_v48 = vld [vmem:[%s4419_s18 + $0x20] sm:$0xff] }
 0x490   : > { %v1970_v14 = vpop.f32.mrb[44].mxu0 }
 0x491   : > { %v2411_v32 = vpack.c.bf16 %v2018_v40, %v1970_v14  ;;  %v3993_v55 = vpop.f32.mrb[45].mxu0 }
 0x492   : > { %v1973_v53 = vpop.f32.mrb[46].mxu0 }
 0x493   : > { %v3994_v10 = vpop.f32.mrb[47].mxu0  ;;  %4058 = vmatmul.mubr.msk.bf16.gmra.mrb[68].mxu0 %vm492_vm0, %v2411_v32  ;;  %v4304_v32 = vld [vmem:[%s4419_s18 + $0x28] sm:$0xff]  ;;  %v4305_v53 = vld [vmem:[%s4419_s18 + $0x30] sm:$0xff] }
 0x498   : > { %v2066_v25 = vpop.f32.mrb[48].mxu0 }
 0x499   : > { %v2412_v49 = vpack.c.bf16 %v2114_v9, %v2066_v25  ;;  %v4005_v52 = vpop.f32.mrb[49].mxu0 }
 0x49a   : > { %v2069_v6 = vpop.f32.mrb[50].mxu0 }
 0x49b   : > { %v4006_v19 = vpop.f32.mrb[51].mxu0  ;;  %4061 = vmatprep.mubr.msk.bf16.mxu0 %vm492_vm0, %v2412_v49  ;;  %v4306_v49 = vld [vmem:[%s4419_s18 + $0x38] sm:$0xff] }
 0x4a0   : > { %v2162_v4 = vpop.f32.mrb[52].mxu0 }
 0x4a1   : > { %v2413_v58 = vpack.c.bf16 %v2210_v47, %v2162_v4  ;;  %v4017_v3 = vpop.f32.mrb[53].mxu0 }
 0x4a2   : > { %v2165_v13 = vpop.f32.mrb[54].mxu0 }
 0x4a3   : > { %v4018_v28 = vpop.f32.mrb[55].mxu0  ;;  %4062 = vmatmul.mubr.msk.bf16.gmra.mrb[72].mxu0 %vm492_vm0, %v2413_v58 }
 0x4a8   : > { %v2258_v1 = vpop.f32.mrb[56].mxu0 }
 0x4a9   : > { %v4029_v23 = vpop.f32.mrb[57].mxu0 }
 0x4aa   : > { %v2261_v39 = vpop.f32.mrb[58].mxu0 }
 0x4ab   : > { %v4030_v57 = vpop.f32.mrb[59].mxu0 }
 0x4ac   : > { %v4307_v57 = vld [vmem:[%s4419_s18 + $0x40] sm:$0xff] }
 0x4b5   : > { %v2354_v16 = vpop.f32.mrb[60].mxu0 }
 0x4b6   : > { %v4041_v34 = vpop.f32.mrb[61].mxu0 }
 0x4b7   : > { %v2357_v17 = vpop.f32.mrb[62].mxu0 }
 0x4b8   : > { %v2306_v41 = vpop.f32.mrb[72].mxu1  ;;  %v4042_v18 = vpop.f32.mrb[63].mxu0  ;;  %v4308_v17 = vld [vmem:[%s4419_s18 + $0x48] sm:$0xff] }
 0x4b9   : > { %v2414_v42 = vpack.c.bf16 %v2306_v41, %v2258_v1  ;;  %v4035_v7 = vpop.f32.mrb[73].mxu1  ;;  %v4309_v18 = vld [vmem:[%s4419_s18 + $0x50] sm:$0xff] }
 0x4ba   : > { %v2309_v2 = vpop.f32.mrb[74].mxu1 }
 0x4bb   : > { %v4036_v0 = vpop.f32.mrb[75].mxu1  ;;  %4065 = vmatprep.mubr.msk.bf16.mxu0 %vm492_vm0, %v2414_v42  ;;  %v4310_v2 = vld [vmem:[%s4419_s18 + $0x58] sm:$0xff] }
 0x4c0   : > { %v2402_v20 = vpop.f32.mrb[76].mxu1 }
 0x4c1   : > { %v2415_v8 = vpack.c.bf16 %v2402_v20, %v2354_v16  ;;  %v4047_v60 = vpop.f32.mrb[77].mxu1 }
 0x4c2   : > { %v2405_v12 = vpop.f32.mrb[78].mxu1 }
 0x4c3   : > { %v4048_v50 = vpop.f32.mrb[79].mxu1  ;;  %4066 = vmatmul.mubr.msk.bf16.gmra.mrb[76].mxu0 %vm492_vm0, %v2415_v8 }
 0x539   : > { %v4055_v5 = vpop.f32.mrb[64].mxu0 }
 0x53a   : > { %v2497_v51 = vpop.f32.mrb[65].mxu0  ;;  %v2506_v26 = vadd.f32 %v4055_v5, %v4952_v21 }
 0x53b   : > { %v2498_v31 = vadd.f32 %v4952_v21, %v2497_v51  ;;  %v4056_v46 = vpop.f32.mrb[66].mxu0 }
 0x53c   : > { %v2500_v24 = vpop.f32.mrb[67].mxu0  ;;  %v2509_v27 = vadd.f32 %v4056_v46, %v4952_v21  ;;  %v4967_v37 = vadd.f32 %v4301_v36, %v2506_v26 }
 0x53d   : > { %v2501_v44 = vadd.f32 %v4952_v21, %v2500_v24  ;;  %v4958_v63 = vadd.f32 %v4299_v59, %v2498_v31  ;;  %v4311_v24 = vld [vmem:[%s4419_s18 + $0x60] sm:$0xff] }
 0x53e   : > { %v2582_v56 = vsel %vm492_vm0, %v4967_v37, 0.0  ;;  %v4974_v40 = vadd.f32 %v4302_v29, %v2509_v27  ;;  %v4312_v27 = vld [vmem:[%s4419_s18 + $0x68] sm:$0xff] }
 0x53f   : > { %v2576_v30 = vsel %vm492_vm0, %v4958_v63, 0.0  ;;  %v4964_v35 = vadd.f32 %v4300_v61, %v2501_v44  ;;  %v4313_v61 = vld [vmem:[%s4419_s18 + $0x70] sm:$0xff] }
 0x540   : > { %2577 = vadd.xlane.f32.xlu0 %v2576_v30  ;;  %v2585_v43 = vsel %vm492_vm0, %v4974_v40, 0.0 }
 0x541   : > { %v2579_v38 = vsel %vm492_vm0, %v4964_v35, 0.0 }
 0x542   : > { %2580 = vadd.xlane.f32.xlu1 %v2579_v38 }
 0x544   : > { %2583 = vadd.xlane.f32.xlu0 %v2582_v56  ;;  %v4314_v56 = vld [vmem:[%s4419_s18 + $0x78] sm:$0xff] }
 0x548   : > { %2586 = vadd.xlane.f32.xlu0 %v2585_v43 }
 0x566   : > { %v4059_v62 = vpop.f32.mrb[68].mxu0 }
 0x567   : > { %v2513_v45 = vpop.f32.mrb[69].mxu0  ;;  %v2522_v9 = vadd.f32 %v4059_v62, %v4952_v21 }
 0x568   : > { %v2514_v15 = vadd.f32 %v4952_v21, %v2513_v45  ;;  %v4060_v33 = vpop.f32.mrb[70].mxu0 }
 0x569   : > { %v2516_v11 = vpop.f32.mrb[71].mxu0  ;;  %v2525_v47 = vadd.f32 %v4060_v33, %v4952_v21  ;;  %v4991_v10 = vadd.f32 %v4305_v53, %v2522_v9 }
 0x56a   : > { %v2517_v22 = vadd.f32 %v4952_v21, %v2516_v11  ;;  %v4983_v54 = vadd.f32 %v4303_v48, %v2514_v15 }
 0x56b   : > { %v4996_v52 = vadd.f32 %v4306_v49, %v2525_v47  ;;  %v2594_v6 = vsel %vm492_vm0, %v4991_v10, 0.0 }
 0x56c   : > { %v2588_v14 = vsel %vm492_vm0, %v4983_v54, 0.0  ;;  %v4988_v55 = vadd.f32 %v4304_v32, %v2517_v22 }
 0x56d   : > { %2589 = vadd.xlane.f32.xlu1 %v2588_v14  ;;  %v2597_v19 = vsel %vm492_vm0, %v4996_v52, 0.0 }
 0x56e   : > { %v2591_v25 = vsel %vm492_vm0, %v4988_v55, 0.0 }
 0x56f   : > { %2592 = vadd.xlane.f32.xlu0 %v2591_v25 }
 0x571   : > { %2595 = vadd.xlane.f32.xlu1 %v2594_v6 }
 0x573   : > { %2598 = vadd.xlane.f32.xlu0 %v2597_v19 }
 0x576   : > { %v4063_v4 = vpop.f32.mrb[72].mxu0 }
 0x577   : > { %v2529_v58 = vpop.f32.mrb[73].mxu0  ;;  %v2538_v3 = vadd.f32 %v4063_v4, %v4952_v21 }
 0x578   : > { %v2530_v13 = vadd.f32 %v4952_v21, %v2529_v58  ;;  %v4064_v28 = vpop.f32.mrb[74].mxu0  ;;  %v4133_v58 = vld [vmem:[%s5653_s7] sm:$0xff]  }
 0x579   : > { %v2532_v1 = vpop.f32.mrb[75].mxu0  ;;  %v2541_v23 = vadd.f32 %v4064_v28, %v4952_v21  ;;  %v5015_v42 = vadd.f32 %v4309_v18, %v2538_v3  ;;  %4069 = vmatprep.subr.bf16.mxu1 %v4133_v58 }
 0x57a   : > { %v2533_v39 = vadd.f32 %v4952_v21, %v2532_v1  ;;  %v5007_v16 = vadd.f32 %v4307_v57, %v2530_v13  ;;  %4070 = vmatpush3.bf16.msra.mxu1 %v4133_v58 }
 0x57b   : > { %v5020_v0 = vadd.f32 %v4310_v2, %v2541_v23  ;;  %v2606_v20 = vsel %vm492_vm0, %v5015_v42, 0.0 }
 0x57c   : > { %v2600_v34 = vsel %vm492_vm0, %v5007_v16, 0.0  ;;  %v5012_v41 = vadd.f32 %v4308_v17, %v2533_v39 }
 0x57d   : > { %2601 = vadd.xlane.f32.xlu1 %v2600_v34  ;;  %v2609_v8 = vsel %vm492_vm0, %v5020_v0, 0.0 }
 0x57e   : > { %v2603_v7 = vsel %vm492_vm0, %v5012_v41, 0.0 }
 0x57f   : > { %2604 = vadd.xlane.f32.xlu0 %v2603_v7 }
 0x581   : > { %2607 = vadd.xlane.f32.xlu1 %v2606_v20 }
 0x583   : > { %2610 = vadd.xlane.f32.xlu0 %v2609_v8 }
 0x596   : > { %v4067_v60 = vpop.f32.mrb[76].mxu0 }
 0x597   : > { %v2545_v12 = vpop.f32.mrb[77].mxu0  ;;  %v2554_v50 = vadd.f32 %v4067_v60, %v4952_v21 }
 0x598   : > { %v2546_v5 = vadd.f32 %v4952_v21, %v2545_v12  ;;  %v4068_v51 = vpop.f32.mrb[78].mxu0 }
 0x599   : > { %v2548_v26 = vpop.f32.mrb[79].mxu0  ;;  %v2557_v31 = vadd.f32 %v4068_v51, %v4952_v21  ;;  %v5039_v36 = vadd.f32 %v4313_v61, %v2554_v50 }
 0x59a   : > { %v2549_v46 = vadd.f32 %v4952_v21, %v2548_v26  ;;  %v5031_v44 = vadd.f32 %v4311_v24, %v2546_v5 }
 0x59b   : > { %v5044_v29 = vadd.f32 %v4314_v56, %v2557_v31  ;;  %v2618_v21 = vsel %vm492_vm0, %v5039_v36, 0.0 }
 0x59c   : > { %v2612_v59 = vsel %vm492_vm0, %v5031_v44, 0.0  ;;  %v5036_v30 = vadd.f32 %v4312_v27, %v2549_v46 }
 0x59d   : > { %2613 = vadd.xlane.f32.xlu1 %v2612_v59  ;;  %v2621_v43 = vsel %vm492_vm0, %v5044_v29, 0.0 }
 0x59e   : > { %v2615_v38 = vsel %vm492_vm0, %v5036_v30, 0.0 }
 0x59f   : > { %2616 = vadd.xlane.f32.xlu0 %v2615_v38 }
 0x5a1   : > { %2619 = vadd.xlane.f32.xlu1 %v2618_v21 }
 0x5a3   : > { %2622 = vadd.xlane.f32.xlu0 %v2621_v43 }
 0x5cd   : > { %v2578_v62 = vpop.xlane.xlu0 %2577 }
 0x5ce   : > { %v2625_v45 = vmul.f32 0.03125, %v2578_v62 }
 0x5cf   : > { %v2581_v9 = vpop.xlane.xlu1 %2580 }
 0x5d0   : > { %v5051_v15 = vsub.f32 %v4958_v63, %v2625_v45  ;;  %v2626_v33 = vmul.f32 0.03125, %v2581_v9 }
 0x5d1   : > { %v2584_v11 = vpop.xlane.xlu0 %2583 }
 0x5d2   : > { %v5054_v47 = vsub.f32 %v4964_v35, %v2626_v33  ;;  %v2627_v22 = vmul.f32 0.03125, %v2584_v11  ;;  %v2657_v48 = vmul.f32 %v5051_v15, %v5051_v15 }
 0x5d4   : > { %v5059_v14 = vsub.f32 %v4967_v37, %v2627_v22  ;;  %v2673_v32 = vsel %vm492_vm0, %v2657_v48, 0.0  ;;  %v2658_v53 = vmul.f32 %v5054_v47, %v5054_v47 }
 0x5d5   : > { %v2587_v25 = vpop.xlane.xlu0 %2586  ;;  %2674 = vadd.xlane.f32.xlu1 %v2673_v32 }
 0x5d6   : > { %v2628_v63 = vmul.f32 0.03125, %v2587_v25  ;;  %v2676_v49 = vsel %vm492_vm0, %v2658_v53, 0.0  ;;  %v2659_v35 = vmul.f32 %v5059_v14, %v5059_v14 }
 0x5d7   : > { %2677 = vadd.xlane.f32.xlu0 %v2676_v49 }
 0x5d8   : > { %v5068_v6 = vsub.f32 %v4974_v40, %v2628_v63  ;;  %v2679_v37 = vsel %vm492_vm0, %v2659_v35, 0.0  ;;  %v4134_v40 = vld [vmem:[%s5653_s7 + $0x8] sm:$0xff]  }
 0x5d9   : > { %2680 = vadd.xlane.f32.xlu1 %v2679_v37  ;;  %4071 = vmatprep.subr.bf16.mxu1 %v4134_v40 }
 0x5da   : > { %v2660_v19 = vmul.f32 %v5068_v6, %v5068_v6  ;;  %4072 = vmatpush3.bf16.msra.mxu1 %v4134_v40 }
 0x5dc   : > { %v2682_v4 = vsel %vm492_vm0, %v2660_v19, 0.0 }
 0x5dd   : > { %2683 = vadd.xlane.f32.xlu0 %v2682_v4 }
 0x5fa   : > { %v2590_v3 = vpop.xlane.xlu1 %2589 }
 0x5fb   : > { %v2629_v13 = vmul.f32 0.03125, %v2590_v3 }
 0x5fc   : > { %v2593_v28 = vpop.xlane.xlu0 %2592 }
 0x5fd   : > { %v5081_v1 = vsub.f32 %v4983_v54, %v2629_v13  ;;  %v2630_v23 = vmul.f32 0.03125, %v2593_v28 }
 0x5fe   : > { %v2596_v39 = vpop.xlane.xlu1 %2595 }
 0x5ff   : > { %v5084_v57 = vsub.f32 %v4988_v55, %v2630_v23  ;;  %v2631_v34 = vmul.f32 0.03125, %v2596_v39  ;;  %v2661_v17 = vmul.f32 %v5081_v1, %v5081_v1 }
 0x600   : > { %v2599_v18 = vpop.xlane.xlu0 %2598 }
 0x601   : > { %v5089_v7 = vsub.f32 %v4991_v10, %v2631_v34  ;;  %v2632_v2 = vmul.f32 0.03125, %v2599_v18  ;;  %v2685_v20 = vsel %vm492_vm0, %v2661_v17, 0.0  ;;  %v2662_v54 = vmul.f32 %v5084_v57, %v5084_v57 }
 0x602   : > { %2686 = vadd.xlane.f32.xlu1 %v2685_v20 }
 0x603   : > { %v5095_v8 = vsub.f32 %v4996_v52, %v2632_v2  ;;  %v2688_v55 = vsel %vm492_vm0, %v2662_v54, 0.0  ;;  %v2663_v60 = vmul.f32 %v5089_v7, %v5089_v7 }
 0x604   : > { %2689 = vadd.xlane.f32.xlu0 %v2688_v55 }
 0x605   : > { %v2691_v12 = vsel %vm492_vm0, %v2663_v60, 0.0  ;;  %v2664_v10 = vmul.f32 %v5095_v8, %v5095_v8 }
 0x606   : > { %2692 = vadd.xlane.f32.xlu1 %v2691_v12  ;;  %v5155_v12 = vld [vmem:[%s5651_s5] ss:$0 sm:$0xff] }
 0x607   : > { %v2694_v50 = vsel %vm492_vm0, %v2664_v10, 0.0 }
 0x608   : > { %2695 = vadd.xlane.f32.xlu0 %v2694_v50 }
 0x60a   : > { %v2602_v5 = vpop.xlane.xlu1 %2601 }
 0x60b   : > { %v2633_v51 = vmul.f32 0.03125, %v2602_v5 }
 0x60c   : > { %v2605_v26 = vpop.xlane.xlu0 %2604 }
 0x60d   : > { %v5105_v52 = vsub.f32 %v5007_v16, %v2633_v51  ;;  %v2634_v31 = vmul.f32 0.03125, %v2605_v26 }
 0x60e   : > { %v2608_v46 = vpop.xlane.xlu1 %2607 }
 0x60f   : > { %v5108_v24 = vsub.f32 %v5012_v41, %v2634_v31  ;;  %v2635_v59 = vmul.f32 0.03125, %v2608_v46  ;;  %v2665_v27 = vmul.f32 %v5105_v52, %v5105_v52  ;;  %v5163_v31 = vld [vmem:[%s5652_s6] ss:$0 sm:$0xff] }
 0x610   : > { %v2611_v61 = vpop.xlane.xlu0 %2610 }
 0x611   : > { %v5113_v38 = vsub.f32 %v5015_v42, %v2635_v59  ;;  %v2636_v56 = vmul.f32 0.03125, %v2611_v61  ;;  %v2697_v21 = vsel %vm492_vm0, %v2665_v27, 0.0  ;;  %v2666_v16 = vmul.f32 %v5108_v24, %v5108_v24 }
 0x612   : > { %2698 = vadd.xlane.f32.xlu1 %v2697_v21 }
 0x613   : > { %v5119_v43 = vsub.f32 %v5020_v0, %v2636_v56  ;;  %v2700_v41 = vsel %vm492_vm0, %v2666_v16, 0.0  ;;  %v2667_v62 = vmul.f32 %v5113_v38, %v5113_v38 }
 0x614   : > { %2701 = vadd.xlane.f32.xlu0 %v2700_v41 }
 0x615   : > { %v2703_v45 = vsel %vm492_vm0, %v2667_v62, 0.0  ;;  %v2668_v42 = vmul.f32 %v5119_v43, %v5119_v43 }
 0x616   : > { %2704 = vadd.xlane.f32.xlu1 %v2703_v45 }
 0x617   : > { %v2706_v9 = vsel %vm492_vm0, %v2668_v42, 0.0 }
 0x618   : > { %2707 = vadd.xlane.f32.xlu0 %v2706_v9 }
 0x62a   : > { %v2614_v33 = vpop.xlane.xlu1 %2613 }
 0x62b   : > { %v2637_v11 = vmul.f32 0.03125, %v2614_v33 }
 0x62c   : > { %v2617_v22 = vpop.xlane.xlu0 %2616 }
 0x62d   : > { %v5129_v0 = vsub.f32 %v5031_v44, %v2637_v11  ;;  %v2638_v48 = vmul.f32 0.03125, %v2617_v22 }
 0x62e   : > { %v2620_v32 = vpop.xlane.xlu1 %2619 }
 0x62f   : > { %v5132_v53 = vsub.f32 %v5036_v30, %v2638_v48  ;;  %v2639_v25 = vmul.f32 0.03125, %v2620_v32  ;;  %v2669_v63 = vmul.f32 %v5129_v0, %v5129_v0 }
 0x630   : > { %v2623_v49 = vpop.xlane.xlu0 %2622 }
 0x631   : > { %v5137_v35 = vsub.f32 %v5039_v36, %v2639_v25  ;;  %v2640_v37 = vmul.f32 0.03125, %v2623_v49  ;;  %v2709_v19 = vsel %vm492_vm0, %v2669_v63, 0.0  ;;  %v2670_v44 = vmul.f32 %v5132_v53, %v5132_v53 }
 0x632   : > { %2710 = vadd.xlane.f32.xlu1 %v2709_v19 }
 0x633   : > { %v5143_v4 = vsub.f32 %v5044_v29, %v2640_v37  ;;  %v2712_v30 = vsel %vm492_vm0, %v2670_v44, 0.0  ;;  %v2671_v58 = vmul.f32 %v5137_v35, %v5137_v35 }
 0x634   : > { %2713 = vadd.xlane.f32.xlu0 %v2712_v30 }
 0x635   : > { %v2715_v3 = vsel %vm492_vm0, %v2671_v58, 0.0  ;;  %v2672_v36 = vmul.f32 %v5143_v4, %v5143_v4 }
 0x636   : > { %2716 = vadd.xlane.f32.xlu1 %v2715_v3 }
 0x637   : > { %v2718_v13 = vsel %vm492_vm0, %v2672_v36, 0.0 }
 0x638   : > { %2719 = vadd.xlane.f32.xlu0 %v2718_v13 }
 0x662   : > { %v2675_v28 = vpop.xlane.xlu1 %2674 }
 0x663   : > { %v2721_v40 = vmul.f32 0.03125, %v2675_v28 }
 0x664   : > { %v2678_v23 = vpop.xlane.xlu0 %2677 }
 0x665   : > { %v2737_v29 = vadd.f32 1e-05, %v2721_v40  ;;  %v2722_v39 = vmul.f32 0.03125, %v2678_v23 }
 0x666   : > { %v2681_v34 = vpop.xlane.xlu1 %2680 }
 0x667   : > { %4203 = vrsqrt.f32 %v2737_v29  ;;  %v2738_v17 = vadd.f32 1e-05, %v2722_v39  ;;  %v2723_v18 = vmul.f32 0.03125, %v2681_v34 }
 0x669   : > { %4205 = vrsqrt.f32 %v2738_v17  ;;  %v2739_v2 = vadd.f32 1e-05, %v2723_v18 }
 0x66a   : > { %v2684_v20 = vpop.xlane.xlu0 %2683 }
 0x66b   : > { %4207 = vrsqrt.f32 %v2739_v2  ;;  %v2724_v54 = vmul.f32 0.03125, %v2684_v20 }
 0x66d   : > { %v2740_v55 = vadd.f32 1e-05, %v2724_v54 }
 0x66f   : > { %4209 = vrsqrt.f32 %v2740_v55 }
 0x671   : > { %v4204_v60 = vpop.eup %4203 }
 0x672   : > { %v2769_v10 = vmul.f32 %v4204_v60, %v5051_v15 }
 0x673   : > { %v4206_v50 = vpop.eup %4205 }
 0x674   : > { %v2770_v5 = vmul.f32 %v4206_v50, %v5054_v47  ;;  %v2792_v51 = vmul.f32 %v5155_v12, %v2769_v10 }
 0x675   : > { %v4208_v26 = vpop.eup %4207 }
 0x676   : > { %v2771_v46 = vmul.f32 %v4208_v26, %v5059_v14  ;;  %v2793_v59 = vmul.f32 %v5155_v12, %v2770_v5  ;;  %v5168_v27 = vadd.f32 %v5163_v31, %v2792_v51 }
 0x678   : > { %v5171_v15 = vadd.f32 %v5163_v31, %v2793_v59  ;;  %v2794_v47 = vmul.f32 %v5155_v12, %v2771_v46 }
 0x679   : > { %v4210_v61 = vpop.eup %4209 }
 0x67a   : > { %v2772_v56 = vmul.f32 %v4210_v61, %v5068_v6  ;;  %v2831_v21 = vpack.c.bf16 %v5171_v15, %v5168_v27  ;;  %v5180_v14 = vadd.f32 %v5163_v31, %v2794_v47 }
 0x67c   : > { %v2795_v16 = vmul.f32 %v5155_v12, %v2772_v56  ;;  %4073 = vmatprep.mubr.msk.bf16.mxu1 %vm492_vm0, %v2831_v21 }
 0x67e   : > { %v5183_v41 = vadd.f32 %v5163_v31, %v2795_v16 }
 0x680   : > { %v2832_v62 = vpack.c.bf16 %v5183_v41, %v5180_v14 }
 0x682   : > { %4074 = vmatmul.mubr.msk.bf16.vlgmr.msra.gmra.mrb[80].mxu1 %vm492_vm0, %v2832_v62 }
 0x68f   : > { %v2687_v45 = vpop.xlane.xlu1 %2686 }
 0x690   : > { %v2725_v6 = vmul.f32 0.03125, %v2687_v45 }
 0x691   : > { %v2690_v42 = vpop.xlane.xlu0 %2689 }
 0x692   : > { %v2741_v9 = vadd.f32 1e-05, %v2725_v6  ;;  %v2726_v33 = vmul.f32 0.03125, %v2690_v42 }
 0x693   : > { %v2693_v11 = vpop.xlane.xlu1 %2692 }
 0x694   : > { %4211 = vrsqrt.f32 %v2741_v9  ;;  %v2742_v22 = vadd.f32 1e-05, %v2726_v33  ;;  %v2727_v48 = vmul.f32 0.03125, %v2693_v11 }
 0x695   : > { %v2696_v32 = vpop.xlane.xlu0 %2695 }
 0x696   : > { %4213 = vrsqrt.f32 %v2742_v22  ;;  %v2743_v25 = vadd.f32 1e-05, %v2727_v48  ;;  %v2728_v63 = vmul.f32 0.03125, %v2696_v32 }
 0x698   : > { %4215 = vrsqrt.f32 %v2743_v25  ;;  %v2744_v49 = vadd.f32 1e-05, %v2728_v63 }
 0x69a   : > { %4217 = vrsqrt.f32 %v2744_v49 }
 0x69e   : > { %v4212_v37 = vpop.eup %4211 }
 0x69f   : > { %v2773_v19 = vmul.f32 %v4212_v37, %v5081_v1  ;;  %v2699_v44 = vpop.xlane.xlu1 %2698 }
 0x6a0   : > { %v4214_v30 = vpop.eup %4213  ;;  %v2729_v58 = vmul.f32 0.03125, %v2699_v44 }
 0x6a1   : > { %v2774_v3 = vmul.f32 %v4214_v30, %v5084_v57  ;;  %v2702_v36 = vpop.xlane.xlu0 %2701  ;;  %v2796_v13 = vmul.f32 %v5155_v12, %v2773_v19 }
 0x6a2   : > { %v4216_v28 = vpop.eup %4215  ;;  %v2745_v40 = vadd.f32 1e-05, %v2729_v58  ;;  %v2730_v23 = vmul.f32 0.03125, %v2702_v36 }
 0x6a3   : > { %v2775_v29 = vmul.f32 %v4216_v28, %v5089_v7  ;;  %v2705_v39 = vpop.xlane.xlu1 %2704  ;;  %v2797_v34 = vmul.f32 %v5155_v12, %v2774_v3  ;;  %v5195_v57 = vadd.f32 %v5163_v31, %v2796_v13 }
 0x6a4   : > { %v4218_v17 = vpop.eup %4217  ;;  %4219 = vrsqrt.f32 %v2745_v40  ;;  %v2746_v18 = vadd.f32 1e-05, %v2730_v23  ;;  %v2731_v1 = vmul.f32 0.03125, %v2705_v39 }
 0x6a5   : > { %v2776_v2 = vmul.f32 %v4218_v17, %v5095_v8  ;;  %v2708_v20 = vpop.xlane.xlu0 %2707  ;;  %v5198_v54 = vadd.f32 %v5163_v31, %v2797_v34  ;;  %v2798_v55 = vmul.f32 %v5155_v12, %v2775_v29 }
 0x6a6   : > { %4221 = vrsqrt.f32 %v2746_v18  ;;  %v2747_v7 = vadd.f32 1e-05, %v2731_v1  ;;  %v2732_v60 = vmul.f32 0.03125, %v2708_v20 }
 0x6a7   : > { %v2833_v10 = vpack.c.bf16 %v5198_v54, %v5195_v57  ;;  %v2799_v50 = vmul.f32 %v5155_v12, %v2776_v2  ;;  %v5206_v8 = vadd.f32 %v5163_v31, %v2798_v55 }
 0x6a8   : > { %4223 = vrsqrt.f32 %v2747_v7  ;;  %v2748_v5 = vadd.f32 1e-05, %v2732_v60  ;;  %v4135_v7 = vld [vmem:[%s5655_s9] sm:$0xff]   ;;  %v4138_v60 = vld [vmem:[%s5655_s9 + $0x18] sm:$0xff]  }
 0x6a9   : > { %4077 = vmatprep.mubr.msk.bf16.mxu1 %vm492_vm0, %v2833_v10  ;;  %v5209_v51 = vadd.f32 %v5163_v31, %v2799_v50  ;;  %4089 = vmatprep.subr.bf16.mxu0 %v4135_v7  ;;  %v5281_v10 = vld [vmem:[%s5654_s8] ss:$0 sm:$0xff] }
 0x6aa   : > { %4225 = vrsqrt.f32 %v2748_v5  ;;  %4090 = vmatpush3.bf16.msra.mxu0 %v4135_v7 }
 0x6ab   : > { %v2834_v26 = vpack.c.bf16 %v5209_v51, %v5206_v8 }
 0x6ad   : > { %4078 = vmatmul.mubr.msk.bf16.gmra.mrb[84].mxu1 %vm492_vm0, %v2834_v26 }
 0x6ae   : > { %v4220_v46 = vpop.eup %4219 }
 0x6af   : > { %v2777_v59 = vmul.f32 %v4220_v46, %v5105_v52 }
 0x6b0   : > { %v4222_v61 = vpop.eup %4221 }
 0x6b1   : > { %v2778_v47 = vmul.f32 %v4222_v61, %v5108_v24  ;;  %v2800_v56 = vmul.f32 %v5155_v12, %v2777_v59 }
 0x6b2   : > { %v4224_v21 = vpop.eup %4223 }
 0x6b3   : > { %v2779_v16 = vmul.f32 %v4224_v21, %v5113_v38  ;;  %v2801_v62 = vmul.f32 %v5155_v12, %v2778_v47  ;;  %v5221_v42 = vadd.f32 %v5163_v31, %v2800_v56 }
 0x6b4   : > { %v4226_v45 = vpop.eup %4225 }
 0x6b5   : > { %v2780_v6 = vmul.f32 %v4226_v45, %v5119_v43  ;;  %v5224_v9 = vadd.f32 %v5163_v31, %v2801_v62  ;;  %v2802_v52 = vmul.f32 %v5155_v12, %v2779_v16 }
 0x6b7   : > { %v2835_v24 = vpack.c.bf16 %v5224_v9, %v5221_v42  ;;  %v2803_v33 = vmul.f32 %v5155_v12, %v2780_v6  ;;  %v5232_v38 = vadd.f32 %v5163_v31, %v2802_v52 }
 0x6b9   : > { %4081 = vmatprep.mubr.msk.bf16.mxu1 %vm492_vm0, %v2835_v24  ;;  %v5235_v43 = vadd.f32 %v5163_v31, %v2803_v33 }
 0x6bb   : > { %v2836_v11 = vpack.c.bf16 %v5235_v43, %v5232_v38 }
 0x6bd   : > { %4082 = vmatmul.mubr.msk.bf16.gmra.mrb[88].mxu1 %vm492_vm0, %v2836_v11 }
 0x6bf   : > { %v2711_v22 = vpop.xlane.xlu1 %2710 }
 0x6c0   : > { %v2733_v48 = vmul.f32 0.03125, %v2711_v22 }
 0x6c1   : > { %v2714_v32 = vpop.xlane.xlu0 %2713 }
 0x6c2   : > { %v2749_v25 = vadd.f32 1e-05, %v2733_v48  ;;  %v2734_v63 = vmul.f32 0.03125, %v2714_v32 }
 0x6c3   : > { %v2717_v49 = vpop.xlane.xlu1 %2716 }
 0x6c4   : > { %4227 = vrsqrt.f32 %v2749_v25  ;;  %v2750_v37 = vadd.f32 1e-05, %v2734_v63  ;;  %v2735_v19 = vmul.f32 0.03125, %v2717_v49 }
 0x6c5   : > { %v2720_v44 = vpop.xlane.xlu0 %2719 }
 0x6c6   : > { %4229 = vrsqrt.f32 %v2750_v37  ;;  %v2751_v30 = vadd.f32 1e-05, %v2735_v19  ;;  %v2736_v58 = vmul.f32 0.03125, %v2720_v44 }
 0x6c8   : > { %4231 = vrsqrt.f32 %v2751_v30  ;;  %v2752_v3 = vadd.f32 1e-05, %v2736_v58 }
 0x6ca   : > { %4233 = vrsqrt.f32 %v2752_v3 }
 0x6ce   : > { %v4228_v36 = vpop.eup %4227 }
 0x6cf   : > { %v2781_v13 = vmul.f32 %v4228_v36, %v5129_v0 }
 0x6d0   : > { %v4230_v28 = vpop.eup %4229 }
 0x6d1   : > { %v2782_v40 = vmul.f32 %v4230_v28, %v5132_v53  ;;  %v2804_v23 = vmul.f32 %v5155_v12, %v2781_v13 }
 0x6d2   : > { %v4232_v29 = vpop.eup %4231 }
 0x6d3   : > { %v2783_v39 = vmul.f32 %v4232_v29, %v5137_v35  ;;  %v2805_v34 = vmul.f32 %v5155_v12, %v2782_v40  ;;  %v5247_v1 = vadd.f32 %v5163_v31, %v2804_v23 }
 0x6d4   : > { %v4234_v17 = vpop.eup %4233 }
 0x6d5   : > { %v2784_v18 = vmul.f32 %v4234_v17, %v5143_v4  ;;  %v5250_v2 = vadd.f32 %v5163_v31, %v2805_v34  ;;  %v2806_v0 = vmul.f32 %v5155_v12, %v2783_v39 }
 0x6d7   : > { %v2837_v53 = vpack.c.bf16 %v5250_v2, %v5247_v1  ;;  %v2807_v20 = vmul.f32 %v5155_v12, %v2784_v18  ;;  %v5258_v35 = vadd.f32 %v5163_v31, %v2806_v0  ;;  %v4136_v12 = vld [vmem:[%s5655_s9 + $0x8] sm:$0xff]  }
 0x6d8   : > { %4091 = vmatprep.subr.bf16.mxu0 %v4136_v12 }
 0x6d9   : > { %4085 = vmatprep.mubr.msk.bf16.mxu1 %vm492_vm0, %v2837_v53  ;;  %v5261_v4 = vadd.f32 %v5163_v31, %v2807_v20  ;;  %4092 = vmatpush3.bf16.msra.mxu0 %v4136_v12  ;;  %v4137_v31 = vld [vmem:[%s5655_s9 + $0x10] sm:$0xff]  }
 0x6da   : > { %4093 = vmatprep.subr.bf16.mxu0 %v4137_v31 }
 0x6db   : > { %v2838_v55 = vpack.c.bf16 %v5261_v4, %v5258_v35 }
 0x6dd   : > { %4086 = vmatmul.mubr.msk.bf16.gmra.mrb[92].mxu1 %vm492_vm0, %v2838_v55  ;;  %4094 = vmatpush3.bf16.msra.mxu0 %v4137_v31 }
 0x6de   : > { %4095 = vmatprep.subr.bf16.mxu0 %v4138_v60 }
 0x6e1   : > { %4096 = vmatpush3.bf16.msra.mxu0 %v4138_v60 }
 0x755   : > { %v4075_v50 = vpop.f32.mrb[80].mxu1 }
 0x756   : > { %v2929_v5 = vadd.f32 %v4075_v50, %v5281_v10  ;;  %v2920_v26 = vpop.f32.mrb[81].mxu1 }
 0x757   : > { %v2921_v46 = vadd.f32 %v5281_v10, %v2920_v26  ;;  %v4076_v59 = vpop.f32.mrb[82].mxu1 }
 0x758   : > { %v2985_v61 = vmul.f32 %v2929_v5, %v2929_v5  ;;  %v2932_v47 = vadd.f32 %v4076_v59, %v5281_v10  ;;  %v2923_v56 = vpop.f32.mrb[83].mxu1 }
 0x759   : > { %v2983_v21 = vmul.f32 %v2921_v46, %v2921_v46  ;;  %v2924_v16 = vadd.f32 %v5281_v10, %v2923_v56 }
 0x75a   : > { %v3001_v62 = vmul.f32 %v2985_v61, %v2929_v5  ;;  %v2986_v45 = vmul.f32 %v2932_v47, %v2932_v47 }
 0x75b   : > { %v2999_v6 = vmul.f32 %v2983_v21, %v2921_v46  ;;  %v2984_v52 = vmul.f32 %v2924_v16, %v2924_v16 }
 0x75c   : > { %v3017_v24 = vmul.f32 0.044715, %v3001_v62  ;;  %v3002_v33 = vmul.f32 %v2986_v45, %v2932_v47 }
 0x75d   : > { %v3015_v11 = vmul.f32 0.044715, %v2999_v6  ;;  %v3000_v22 = vmul.f32 %v2984_v52, %v2924_v16 }
 0x75e   : > { %v3033_v48 = vadd.f32 %v3017_v24, %v2929_v5  ;;  %v3018_v32 = vmul.f32 0.044715, %v3002_v33 }
 0x75f   : > { %v3031_v25 = vadd.f32 %v3015_v11, %v2921_v46  ;;  %v3016_v63 = vmul.f32 0.044715, %v3000_v22 }
 0x760   : > { %v3049_v49 = vmul.f32 0.7978846, %v3033_v48  ;;  %v3034_v37 = vadd.f32 %v3018_v32, %v2932_v47 }
 0x761   : > { %v3047_v19 = vmul.f32 0.7978846, %v3031_v25  ;;  %v3032_v44 = vadd.f32 %v3016_v63, %v2924_v16 }
 0x762   : > { %4235 = vtanh.f32 %v3049_v49  ;;  %v3050_v30 = vmul.f32 0.7978846, %v3034_v37 }
 0x763   : > { %4237 = vtanh.f32 %v3047_v19  ;;  %v3048_v58 = vmul.f32 0.7978846, %v3032_v44 }
 0x764   : > { %4239 = vtanh.f32 %v3050_v30 }
 0x765   : > { %4241 = vtanh.f32 %v3048_v58 }
 0x76c   : > { %v4236_v3 = vpop.eup %4235 }
 0x76d   : > { %v4238_v36 = vpop.eup %4237  ;;  %v3081_v13 = vadd.f32 1.0, %v4236_v3 }
 0x76e   : > { %v4240_v28 = vpop.eup %4239  ;;  %v3079_v40 = vadd.f32 1.0, %v4238_v36 }
 0x76f   : > { %v4242_v23 = vpop.eup %4241  ;;  %v3097_v29 = vmul.f32 0.5, %v3081_v13  ;;  %v3082_v39 = vadd.f32 1.0, %v4240_v28 }
 0x770   : > { %v3095_v34 = vmul.f32 0.5, %v3079_v40  ;;  %v3080_v17 = vadd.f32 1.0, %v4242_v23 }
 0x771   : > { %v3098_v18 = vmul.f32 0.5, %v3082_v39  ;;  %v3113_v53 = vmul.f32 %v3097_v29, %v2929_v5 }
 0x772   : > { %v3096_v0 = vmul.f32 0.5, %v3080_v17  ;;  %v3111_v55 = vmul.f32 %v3095_v34, %v2921_v46 }
 0x773   : > { %v3114_v20 = vmul.f32 %v3098_v18, %v2932_v47 }
 0x774   : > { %v3112_v7 = vmul.f32 %v3096_v0, %v2924_v16 }
 0x775   : > { %v3128_v12 = vpack.c.bf16 %v3114_v20, %v3113_v53 }
 0x776   : > { %v3127_v31 = vpack.c.bf16 %v3112_v7, %v3111_v55 }
 0x778   : > { %4097 = vmatprep.mubr.msk.bf16.mxu0 %vm3174_vm4, %v3127_v31 }
 0x779   : > { %4098 = vmatmul.mubr.msk.bf16.vlgmr.msra.gmra.mrb[80].mxu0 %vm3174_vm4, %v3128_v12 }
 0x780   : > { %v4079_v60 = vpop.f32.mrb[84].mxu1 }
 0x781   : > { %v5290_v50 = vadd.f32 %v4079_v60, %v5281_v10  ;;  %v2936_v26 = vpop.f32.mrb[85].mxu1 }
 0x782   : > { %v5293_v59 = vadd.f32 %v5281_v10, %v2936_v26  ;;  %v4080_v61 = vpop.f32.mrb[86].mxu1 }
 0x783   : > { %v2989_v5 = vmul.f32 %v5290_v50, %v5290_v50  ;;  %v5298_v46 = vadd.f32 %v4080_v61, %v5281_v10  ;;  %v2939_v47 = vpop.f32.mrb[87].mxu1 }
 0x784   : > { %v2987_v56 = vmul.f32 %v5293_v59, %v5293_v59  ;;  %v5303_v21 = vadd.f32 %v5281_v10, %v2939_v47 }
 0x785   : > { %v3005_v16 = vmul.f32 %v2989_v5, %v5290_v50  ;;  %v2990_v62 = vmul.f32 %v5298_v46, %v5298_v46 }
 0x786   : > { %v3003_v45 = vmul.f32 %v2987_v56, %v5293_v59  ;;  %v2988_v6 = vmul.f32 %v5303_v21, %v5303_v21 }
 0x787   : > { %v3021_v52 = vmul.f32 0.044715, %v3005_v16  ;;  %v3006_v24 = vmul.f32 %v2990_v62, %v5298_v46 }
 0x788   : > { %v3019_v33 = vmul.f32 0.044715, %v3003_v45  ;;  %v3004_v11 = vmul.f32 %v2988_v6, %v5303_v21 }
 0x789   : > { %v3037_v22 = vadd.f32 %v3021_v52, %v5290_v50  ;;  %v3022_v48 = vmul.f32 0.044715, %v3006_v24 }
 0x78a   : > { %v3035_v32 = vadd.f32 %v3019_v33, %v5293_v59  ;;  %v3020_v25 = vmul.f32 0.044715, %v3004_v11 }
 0x78b   : > { %v3053_v63 = vmul.f32 0.7978846, %v3037_v22  ;;  %v3038_v49 = vadd.f32 %v3022_v48, %v5298_v46 }
 0x78c   : > { %v3051_v37 = vmul.f32 0.7978846, %v3035_v32  ;;  %v3036_v19 = vadd.f32 %v3020_v25, %v5303_v21 }
 0x78d   : > { %4243 = vtanh.f32 %v3053_v63  ;;  %v3054_v44 = vmul.f32 0.7978846, %v3038_v49 }
 0x78e   : > { %4245 = vtanh.f32 %v3051_v37  ;;  %v3052_v30 = vmul.f32 0.7978846, %v3036_v19 }
 0x78f   : > { %4247 = vtanh.f32 %v3054_v44 }
 0x790   : > { %4249 = vtanh.f32 %v3052_v30  ;;  %v4083_v58 = vpop.f32.mrb[88].mxu1 }
 0x791   : > { %v5318_v3 = vadd.f32 %v4083_v58, %v5281_v10  ;;  %v2952_v36 = vpop.f32.mrb[89].mxu1 }
 0x792   : > { %v5321_v13 = vadd.f32 %v5281_v10, %v2952_v36  ;;  %v4084_v28 = vpop.f32.mrb[90].mxu1 }
 0x793   : > { %v2993_v40 = vmul.f32 %v5318_v3, %v5318_v3  ;;  %v2964_v23 = vadd.f32 %v4084_v28, %v5281_v10  ;;  %v2955_v29 = vpop.f32.mrb[91].mxu1 }
 0x794   : > { %v2991_v39 = vmul.f32 %v5321_v13, %v5321_v13  ;;  %v2956_v34 = vadd.f32 %v5281_v10, %v2955_v29 }
 0x795   : > { %v3009_v17 = vmul.f32 %v2993_v40, %v5318_v3  ;;  %v2994_v18 = vmul.f32 %v2964_v23, %v2964_v23 }
 0x796   : > { %v3007_v0 = vmul.f32 %v2991_v39, %v5321_v13  ;;  %v2992_v53 = vmul.f32 %v2956_v34, %v2956_v34 }
 0x797   : > { %v4244_v20 = vpop.eup %4243  ;;  %v3025_v55 = vmul.f32 0.044715, %v3009_v17  ;;  %v3010_v7 = vmul.f32 %v2994_v18, %v2964_v23 }
 0x798   : > { %v4246_v12 = vpop.eup %4245  ;;  %v3085_v31 = vadd.f32 1.0, %v4244_v20  ;;  %v3023_v60 = vmul.f32 0.044715, %v3007_v0  ;;  %v3008_v26 = vmul.f32 %v2992_v53, %v2956_v34 }
 0x799   : > { %v4248_v61 = vpop.eup %4247  ;;  %v3083_v5 = vadd.f32 1.0, %v4246_v12  ;;  %v3041_v47 = vadd.f32 %v3025_v55, %v5318_v3  ;;  %v3026_v56 = vmul.f32 0.044715, %v3010_v7 }
 0x79a   : > { %v4250_v16 = vpop.eup %4249  ;;  %v3101_v62 = vmul.f32 0.5, %v3085_v31  ;;  %v3086_v45 = vadd.f32 1.0, %v4248_v61  ;;  %v3039_v6 = vadd.f32 %v3023_v60, %v5321_v13  ;;  %v3024_v52 = vmul.f32 0.044715, %v3008_v26 }
 0x79b   : > { %v3099_v24 = vmul.f32 0.5, %v3083_v5  ;;  %v3084_v33 = vadd.f32 1.0, %v4250_v16  ;;  %v3057_v11 = vmul.f32 0.7978846, %v3041_v47  ;;  %v3042_v22 = vadd.f32 %v3026_v56, %v2964_v23 }
 0x79c   : > { %v3102_v48 = vmul.f32 0.5, %v3086_v45  ;;  %v3055_v32 = vmul.f32 0.7978846, %v3039_v6  ;;  %v3040_v25 = vadd.f32 %v3024_v52, %v2956_v34  ;;  %v3117_v37 = vmul.f32 %v3101_v62, %v5290_v50 }
 0x79d   : > { %v3100_v63 = vmul.f32 0.5, %v3084_v33  ;;  %4251 = vtanh.f32 %v3057_v11  ;;  %v3058_v49 = vmul.f32 0.7978846, %v3042_v22  ;;  %v3115_v30 = vmul.f32 %v3099_v24, %v5293_v59 }
 0x79e   : > { %v3118_v19 = vmul.f32 %v3102_v48, %v5298_v46  ;;  %4253 = vtanh.f32 %v3055_v32  ;;  %v3056_v44 = vmul.f32 0.7978846, %v3040_v25 }
 0x79f   : > { %v3116_v58 = vmul.f32 %v3100_v63, %v5303_v21  ;;  %4255 = vtanh.f32 %v3058_v49 }
 0x7a0   : > { %4257 = vtanh.f32 %v3056_v44  ;;  %v3130_v36 = vpack.c.bf16 %v3118_v19, %v3117_v37 }
 0x7a1   : > { %v3129_v28 = vpack.c.bf16 %v3116_v58, %v3115_v30 }
 0x7a3   : > { %4101 = vmatprep.mubr.msk.bf16.mxu0 %vm3174_vm4, %v3129_v28 }
 0x7a4   : > { %4102 = vmatmul.mubr.msk.bf16.gmra.mrb[84].mxu0 %vm3174_vm4, %v3130_v36 }
 0x7a7   : > { %v4252_v40 = vpop.eup %4251 }
 0x7a8   : > { %v4254_v29 = vpop.eup %4253  ;;  %v3089_v39 = vadd.f32 1.0, %v4252_v40 }
 0x7a9   : > { %v4256_v50 = vpop.eup %4255  ;;  %v3087_v17 = vadd.f32 1.0, %v4254_v29 }
 0x7aa   : > { %v4258_v46 = vpop.eup %4257  ;;  %v3105_v18 = vmul.f32 0.5, %v3089_v39  ;;  %v3090_v0 = vadd.f32 1.0, %v4256_v50 }
 0x7ab   : > { %v3103_v53 = vmul.f32 0.5, %v3087_v17  ;;  %v3088_v59 = vadd.f32 1.0, %v4258_v46 }
 0x7ac   : > { %v3106_v20 = vmul.f32 0.5, %v3090_v0  ;;  %v3121_v55 = vmul.f32 %v3105_v18, %v5318_v3 }
 0x7ad   : > { %v3104_v21 = vmul.f32 0.5, %v3088_v59  ;;  %v3119_v12 = vmul.f32 %v3103_v53, %v5321_v13 }
 0x7ae   : > { %v3122_v7 = vmul.f32 %v3106_v20, %v2964_v23 }
 0x7af   : > { %v3120_v31 = vmul.f32 %v3104_v21, %v2956_v34 }
 0x7b0   : > { %v4087_v60 = vpop.f32.mrb[92].mxu1  ;;  %v3132_v5 = vpack.c.bf16 %v3122_v7, %v3121_v55 }
 0x7b1   : > { %v2977_v26 = vadd.f32 %v4087_v60, %v5281_v10  ;;  %v2968_v61 = vpop.f32.mrb[93].mxu1  ;;  %v3131_v16 = vpack.c.bf16 %v3120_v31, %v3119_v12  ;;  %v5352_v60 = vld [vmem:[%s5656_s10] ss:$0 sm:$0xff] }
 0x7b2   : > { %v2969_v47 = vadd.f32 %v5281_v10, %v2968_v61  ;;  %v4088_v56 = vpop.f32.mrb[94].mxu1 }
 0x7b3   : > { %v2997_v62 = vmul.f32 %v2977_v26, %v2977_v26  ;;  %v2980_v45 = vadd.f32 %v4088_v56, %v5281_v10  ;;  %v2971_v6 = vpop.f32.mrb[95].mxu1  ;;  %4105 = vmatprep.mubr.msk.bf16.mxu0 %vm3174_vm4, %v3131_v16 }
 0x7b4   : > { %v2995_v52 = vmul.f32 %v2969_v47, %v2969_v47  ;;  %v2972_v3 = vadd.f32 %v5281_v10, %v2971_v6  ;;  %4106 = vmatmul.mubr.msk.bf16.gmra.mrb[88].mxu0 %vm3174_vm4, %v3132_v5 }
 0x7b5   : > { %v3013_v13 = vmul.f32 %v2997_v62, %v2977_v26  ;;  %v2998_v23 = vmul.f32 %v2980_v45, %v2980_v45 }
 0x7b6   : > { %v3011_v34 = vmul.f32 %v2995_v52, %v2969_v47  ;;  %v2996_v24 = vmul.f32 %v2972_v3, %v2972_v3 }
 0x7b7   : > { %v3029_v33 = vmul.f32 0.044715, %v3013_v13  ;;  %v3014_v11 = vmul.f32 %v2998_v23, %v2980_v45 }
 0x7b8   : > { %v3027_v22 = vmul.f32 0.044715, %v3011_v34  ;;  %v3012_v48 = vmul.f32 %v2996_v24, %v2972_v3 }
 0x7b9   : > { %v3045_v32 = vadd.f32 %v3029_v33, %v2977_v26  ;;  %v3030_v25 = vmul.f32 0.044715, %v3014_v11 }
 0x7ba   : > { %v3043_v63 = vadd.f32 %v3027_v22, %v2969_v47  ;;  %v3028_v49 = vmul.f32 0.044715, %v3012_v48 }
 0x7bb   : > { %v3061_v37 = vmul.f32 0.7978846, %v3045_v32  ;;  %v3046_v19 = vadd.f32 %v3030_v25, %v2980_v45 }
 0x7bc   : > { %v3059_v44 = vmul.f32 0.7978846, %v3043_v63  ;;  %v3044_v10 = vadd.f32 %v3028_v49, %v2972_v3 }
 0x7bd   : > { %4259 = vtanh.f32 %v3061_v37  ;;  %v3062_v30 = vmul.f32 0.7978846, %v3046_v19 }
 0x7be   : > { %4261 = vtanh.f32 %v3059_v44  ;;  %v3060_v58 = vmul.f32 0.7978846, %v3044_v10 }
 0x7bf   : > { %4263 = vtanh.f32 %v3062_v30 }
 0x7c0   : > { %4265 = vtanh.f32 %v3060_v58 }
 0x7c7   : > { %v4260_v36 = vpop.eup %4259 }
 0x7c8   : > { %v4262_v28 = vpop.eup %4261  ;;  %v3093_v40 = vadd.f32 1.0, %v4260_v36 }
 0x7c9   : > { %v4264_v29 = vpop.eup %4263  ;;  %v3091_v39 = vadd.f32 1.0, %v4262_v28 }
 0x7ca   : > { %v4266_v50 = vpop.eup %4265  ;;  %v3109_v17 = vmul.f32 0.5, %v3093_v40  ;;  %v3094_v46 = vadd.f32 1.0, %v4264_v29 }
 0x7cb   : > { %v3107_v18 = vmul.f32 0.5, %v3091_v39  ;;  %v3092_v0 = vadd.f32 1.0, %v4266_v50 }
 0x7cc   : > { %v3110_v53 = vmul.f32 0.5, %v3094_v46  ;;  %v3125_v20 = vmul.f32 %v3109_v17, %v2977_v26 }
 0x7cd   : > { %v3108_v59 = vmul.f32 0.5, %v3092_v0  ;;  %v3123_v55 = vmul.f32 %v3107_v18, %v2969_v47 }
 0x7ce   : > { %v3126_v21 = vmul.f32 %v3110_v53, %v2980_v45 }
 0x7cf   : > { %v3124_v7 = vmul.f32 %v3108_v59, %v2972_v3 }
 0x7d0   : > { %v3134_v12 = vpack.c.bf16 %v3126_v21, %v3125_v20 }
 0x7d1   : > { %v3133_v31 = vpack.c.bf16 %v3124_v7, %v3123_v55 }
 0x7d3   : > { %4109 = vmatprep.mubr.msk.bf16.mxu0 %vm3174_vm4, %v3133_v31 }
 0x7d4   : > { %4110 = vmatmul.mubr.msk.bf16.gmra.mrb[92].mxu0 %vm3174_vm4, %v3134_v12 }
 0x84c   : > { %v4099_v61 = vpop.f32.mrb[80].mxu0 }
 0x84d   : > { %v3242_v5 = vadd.f32 %v4099_v61, %v5352_v60  ;;  %v3233_v56 = vpop.f32.mrb[81].mxu0 }
 0x84e   : > { %v3234_v26 = vadd.f32 %v5352_v60, %v3233_v56  ;;  %v4100_v16 = vpop.f32.mrb[82].mxu0 }
 0x84f   : > { %v3245_v47 = vadd.f32 %v4100_v16, %v5352_v60  ;;  %v3236_v62 = vpop.f32.mrb[83].mxu0  ;;  %v5358_v45 = vadd.f32 %v3242_v5, %v5180_v14 }
 0x850   : > { %v3237_v6 = vadd.f32 %v5352_v60, %v3236_v62  ;;  %v5367_v13 = vadd.f32 %v3234_v26, %v5168_v27 }
 0x851   : > { %v5362_v52 = vadd.f32 %v3245_v47, %v5183_v41  ;;  %v3318_v3 = vsel %vm492_vm0, %v5358_v45, 0.0 }
 0x852   : > { %3319 = vadd.xlane.f32.xlu1 %v3318_v3  ;;  %v5370_v23 = vadd.f32 %v3237_v6, %v5171_v15  ;;  %v3312_v14 = vsel %vm492_vm0, %v5367_v13, 0.0 }
 0x853   : > { %v3321_v34 = vsel %vm492_vm0, %v5362_v52, 0.0 }
 0x854   : > { %3322 = vadd.xlane.f32.xlu0 %v3321_v34  ;;  %v3315_v41 = vsel %vm492_vm0, %v5370_v23, 0.0 }
 0x856   : > { %3313 = vadd.xlane.f32.xlu1 %v3312_v14 }
 0x858   : > { %3316 = vadd.xlane.f32.xlu0 %v3315_v41 }
 0x877   : > { %v4103_v24 = vpop.f32.mrb[84].mxu0 }
 0x878   : > { %v3258_v27 = vadd.f32 %v4103_v24, %v5352_v60  ;;  %v3249_v33 = vpop.f32.mrb[85].mxu0 }
 0x879   : > { %v3250_v11 = vadd.f32 %v5352_v60, %v3249_v33  ;;  %v4104_v15 = vpop.f32.mrb[86].mxu0 }
 0x87a   : > { %v5381_v22 = vadd.f32 %v3258_v27, %v5206_v8  ;;  %v3261_v48 = vadd.f32 %v4104_v15, %v5352_v60  ;;  %v3252_v32 = vpop.f32.mrb[87].mxu0 }
 0x87b   : > { %v3253_v25 = vadd.f32 %v5352_v60, %v3252_v32  ;;  %v5386_v63 = vadd.f32 %v3250_v11, %v5195_v57 }
 0x87c   : > { %v5389_v49 = vadd.f32 %v3261_v48, %v5209_v51  ;;  %v3330_v37 = vsel %vm492_vm0, %v5381_v22, 0.0 }
 0x87d   : > { %3331 = vadd.xlane.f32.xlu1 %v3330_v37  ;;  %v5394_v19 = vadd.f32 %v3253_v25, %v5198_v54  ;;  %v3324_v44 = vsel %vm492_vm0, %v5386_v63, 0.0 }
 0x87e   : > { %v3333_v8 = vsel %vm492_vm0, %v5389_v49, 0.0 }
 0x87f   : > { %3334 = vadd.xlane.f32.xlu0 %v3333_v8  ;;  %v3327_v57 = vsel %vm492_vm0, %v5394_v19, 0.0 }
 0x881   : > { %3325 = vadd.xlane.f32.xlu1 %v3324_v44 }
 0x883   : > { %3328 = vadd.xlane.f32.xlu0 %v3327_v57 }
 0x887   : > { %v4107_v51 = vpop.f32.mrb[88].mxu0 }
 0x888   : > { %v3274_v10 = vadd.f32 %v4107_v51, %v5352_v60  ;;  %v3265_v30 = vpop.f32.mrb[89].mxu0 }
 0x889   : > { %v3266_v58 = vadd.f32 %v5352_v60, %v3265_v30  ;;  %v4108_v54 = vpop.f32.mrb[90].mxu0 }
 0x88a   : > { %v5405_v36 = vadd.f32 %v3274_v10, %v5232_v38  ;;  %v3277_v28 = vadd.f32 %v4108_v54, %v5352_v60  ;;  %v3268_v40 = vpop.f32.mrb[91].mxu0 }
 0x88b   : > { %v3269_v29 = vadd.f32 %v5352_v60, %v3268_v40  ;;  %v5410_v39 = vadd.f32 %v3266_v58, %v5221_v42 }
 0x88c   : > { %v5413_v50 = vadd.f32 %v3277_v28, %v5235_v43  ;;  %v3342_v17 = vsel %vm492_vm0, %v5405_v36, 0.0 }
 0x88d   : > { %3343 = vadd.xlane.f32.xlu1 %v3342_v17  ;;  %v5418_v46 = vadd.f32 %v3269_v29, %v5224_v9  ;;  %v3336_v18 = vsel %vm492_vm0, %v5410_v39, 0.0 }
 0x88e   : > { %v3345_v38 = vsel %vm492_vm0, %v5413_v50, 0.0 }
 0x88f   : > { %3346 = vadd.xlane.f32.xlu0 %v3345_v38  ;;  %v3339_v42 = vsel %vm492_vm0, %v5418_v46, 0.0 }
 0x891   : > { %3337 = vadd.xlane.f32.xlu1 %v3336_v18 }
 0x893   : > { %3340 = vadd.xlane.f32.xlu0 %v3339_v42 }
 0x8a7   : > { %v4111_v43 = vpop.f32.mrb[92].mxu0 }
 0x8a8   : > { %v3281_v0 = vpop.f32.mrb[93].mxu0  ;;  %v3290_v53 = vadd.f32 %v4111_v43, %v5352_v60 }
 0x8a9   : > { %v3282_v59 = vadd.f32 %v5352_v60, %v3281_v0  ;;  %v4112_v9 = vpop.f32.mrb[94].mxu0 }
 0x8aa   : > { %v3284_v20 = vpop.f32.mrb[95].mxu0  ;;  %v3293_v55 = vadd.f32 %v4112_v9, %v5352_v60  ;;  %v5434_v12 = vadd.f32 %v3290_v53, %v5258_v35 }
 0x8ab   : > { %v5429_v21 = vadd.f32 %v3282_v59, %v5247_v1  ;;  %v3285_v7 = vadd.f32 %v5352_v60, %v3284_v20 }
 0x8ac   : > { %v5442_v5 = vadd.f32 %v3293_v55, %v5261_v4  ;;  %v3354_v60 = vsel %vm492_vm0, %v5434_v12, 0.0 }
 0x8ad   : > { %v5437_v31 = vadd.f32 %v3285_v7, %v5250_v2  ;;  %v3348_v61 = vsel %vm492_vm0, %v5429_v21, 0.0 }
 0x8ae   : > { %3349 = vadd.xlane.f32.xlu1 %v3348_v61  ;;  %v3357_v35 = vsel %vm492_vm0, %v5442_v5, 0.0 }
 0x8af   : > { %v3351_v1 = vsel %vm492_vm0, %v5437_v31, 0.0 }
 0x8b0   : > { %3352 = vadd.xlane.f32.xlu0 %v3351_v1 }
 0x8b2   : > { %3355 = vadd.xlane.f32.xlu1 %v3354_v60 }
 0x8b4   : > { %3358 = vadd.xlane.f32.xlu0 %v3357_v35 }
 0x8df   : > { %v3320_v2 = vpop.xlane.xlu1 %3319 }
 0x8e0   : > { %v3362_v56 = vmul.f32 0.03125, %v3320_v2 }
 0x8e1   : > { %v3323_v26 = vpop.xlane.xlu0 %3322 }
 0x8e2   : > { %v5451_v16 = vsub.f32 %v5358_v45, %v3362_v56  ;;  %v3363_v4 = vmul.f32 0.03125, %v3323_v26 }
 0x8e3   : > { %v3314_v47 = vpop.xlane.xlu1 %3313 }
 0x8e4   : > { %v5454_v62 = vsub.f32 %v5362_v52, %v3363_v4  ;;  %v3360_v6 = vmul.f32 0.03125, %v3314_v47  ;;  %v3394_v3 = vmul.f32 %v5451_v16, %v5451_v16 }
 0x8e5   : > { %v3317_v34 = vpop.xlane.xlu0 %3316 }
 0x8e6   : > { %v5459_v14 = vsub.f32 %v5367_v13, %v3360_v6  ;;  %v3361_v41 = vmul.f32 0.03125, %v3317_v34  ;;  %v3414_v24 = vsel %vm492_vm0, %v3394_v3, 0.0  ;;  %v3395_v45 = vmul.f32 %v5454_v62, %v5454_v62 }
 0x8e7   : > { %3415 = vadd.xlane.f32.xlu1 %v3414_v24 }
 0x8e8   : > { %v5465_v27 = vsub.f32 %v5370_v23, %v3361_v41  ;;  %v3417_v52 = vsel %vm492_vm0, %v3395_v45, 0.0  ;;  %v3392_v33 = vmul.f32 %v5459_v14, %v5459_v14 }
 0x8e9   : > { %3418 = vadd.xlane.f32.xlu0 %v3417_v52 }
 0x8ea   : > { %v3408_v11 = vsel %vm492_vm0, %v3392_v33, 0.0  ;;  %v3393_v13 = vmul.f32 %v5465_v27, %v5465_v27 }
 0x8eb   : > { %3409 = vadd.xlane.f32.xlu1 %v3408_v11 }
 0x8ec   : > { %v3411_v15 = vsel %vm492_vm0, %v3393_v13, 0.0 }
 0x8ed   : > { %3412 = vadd.xlane.f32.xlu0 %v3411_v15 }
 0x90a   : > { %v3332_v48 = vpop.xlane.xlu1 %3331 }
 0x90b   : > { %v3366_v32 = vmul.f32 0.03125, %v3332_v48 }
 0x90c   : > { %v3335_v25 = vpop.xlane.xlu0 %3334 }
 0x90d   : > { %v5475_v23 = vsub.f32 %v5381_v22, %v3366_v32  ;;  %v3367_v37 = vmul.f32 0.03125, %v3335_v25 }
 0x90e   : > { %v3326_v8 = vpop.xlane.xlu1 %3325 }
 0x90f   : > { %v5478_v44 = vsub.f32 %v5389_v49, %v3367_v37  ;;  %v3364_v57 = vmul.f32 0.03125, %v3326_v8  ;;  %v3398_v51 = vmul.f32 %v5475_v23, %v5475_v23 }
 0x910   : > { %v3329_v10 = vpop.xlane.xlu0 %3328 }
 0x911   : > { %v5483_v30 = vsub.f32 %v5386_v63, %v3364_v57  ;;  %v3365_v58 = vmul.f32 0.03125, %v3329_v10  ;;  %v3426_v54 = vsel %vm492_vm0, %v3398_v51, 0.0  ;;  %v3399_v22 = vmul.f32 %v5478_v44, %v5478_v44 }
 0x912   : > { %3427 = vadd.xlane.f32.xlu1 %v3426_v54 }
 0x913   : > { %v5489_v28 = vsub.f32 %v5394_v19, %v3365_v58  ;;  %v3429_v49 = vsel %vm492_vm0, %v3399_v22, 0.0  ;;  %v3396_v40 = vmul.f32 %v5483_v30, %v5483_v30 }
 0x914   : > { %3430 = vadd.xlane.f32.xlu0 %v3429_v49 }
 0x915   : > { %v3420_v29 = vsel %vm492_vm0, %v3396_v40, 0.0  ;;  %v3397_v63 = vmul.f32 %v5489_v28, %v5489_v28 }
 0x916   : > { %3421 = vadd.xlane.f32.xlu1 %v3420_v29  ;;  %v5549_v29 = vld [vmem:[%s5657_s11] ss:$0 sm:$0xff] }
 0x917   : > { %v3423_v17 = vsel %vm492_vm0, %v3397_v63, 0.0 }
 0x918   : > { %3424 = vadd.xlane.f32.xlu0 %v3423_v17 }
 0x91a   : > { %v3344_v38 = vpop.xlane.xlu1 %3343 }
 0x91b   : > { %v3370_v18 = vmul.f32 0.03125, %v3344_v38  ;;  %v5555_v38 = vld [vmem:[%s5658_s12] ss:$0 sm:$0xff] }
 0x91c   : > { %v3347_v42 = vpop.xlane.xlu0 %3346 }
 0x91d   : > { %v5499_v19 = vsub.f32 %v5405_v36, %v3370_v18  ;;  %v3371_v43 = vmul.f32 0.03125, %v3347_v42 }
 0x91e   : > { %v3338_v0 = vpop.xlane.xlu1 %3337 }
 0x91f   : > { %v5502_v53 = vsub.f32 %v5413_v50, %v3371_v43  ;;  %v3368_v59 = vmul.f32 0.03125, %v3338_v0  ;;  %v3402_v9 = vmul.f32 %v5499_v19, %v5499_v19 }
 0x920   : > { %v3341_v20 = vpop.xlane.xlu0 %3340 }
 0x921   : > { %v5507_v55 = vsub.f32 %v5410_v39, %v3368_v59  ;;  %v3369_v7 = vmul.f32 0.03125, %v3341_v20  ;;  %v3438_v61 = vsel %vm492_vm0, %v3402_v9, 0.0  ;;  %v3403_v36 = vmul.f32 %v5502_v53, %v5502_v53 }
 0x922   : > { %3439 = vadd.xlane.f32.xlu1 %v3438_v61 }
 0x923   : > { %v5513_v1 = vsub.f32 %v5418_v46, %v3369_v7  ;;  %v3441_v50 = vsel %vm492_vm0, %v3403_v36, 0.0  ;;  %v3400_v60 = vmul.f32 %v5507_v55, %v5507_v55 }
 0x924   : > { %3442 = vadd.xlane.f32.xlu0 %v3441_v50 }
 0x925   : > { %v3432_v35 = vsel %vm492_vm0, %v3400_v60, 0.0  ;;  %v3401_v39 = vmul.f32 %v5513_v1, %v5513_v1 }
 0x926   : > { %3433 = vadd.xlane.f32.xlu1 %v3432_v35 }
 0x927   : > { %v3435_v2 = vsel %vm492_vm0, %v3401_v39, 0.0 }
 0x928   : > { %3436 = vadd.xlane.f32.xlu0 %v3435_v2 }
 0x93b   : > { %v3350_v56 = vpop.xlane.xlu1 %3349 }
 0x93c   : > { %v3372_v26 = vmul.f32 0.03125, %v3350_v56 }
 0x93d   : > { %v3353_v4 = vpop.xlane.xlu0 %3352 }
 0x93e   : > { %v5523_v46 = vsub.f32 %v5429_v21, %v3372_v26  ;;  %v3373_v47 = vmul.f32 0.03125, %v3353_v4 }
 0x93f   : > { %v3356_v6 = vpop.xlane.xlu1 %3355 }
 0x940   : > { %v5526_v3 = vsub.f32 %v5437_v31, %v3373_v47  ;;  %v3374_v34 = vmul.f32 0.03125, %v3356_v6  ;;  %v3404_v41 = vmul.f32 %v5523_v46, %v5523_v46 }
 0x941   : > { %v3359_v24 = vpop.xlane.xlu0 %3358 }
 0x942   : > { %v5531_v45 = vsub.f32 %v5434_v12, %v3374_v34  ;;  %v3375_v52 = vmul.f32 0.03125, %v3359_v24  ;;  %v3444_v33 = vsel %vm492_vm0, %v3404_v41, 0.0  ;;  %v3405_v21 = vmul.f32 %v5526_v3, %v5526_v3 }
 0x943   : > { %3445 = vadd.xlane.f32.xlu1 %v3444_v33 }
 0x944   : > { %v5537_v11 = vsub.f32 %v5442_v5, %v3375_v52  ;;  %v3447_v31 = vsel %vm492_vm0, %v3405_v21, 0.0  ;;  %v3406_v13 = vmul.f32 %v5531_v45, %v5531_v45 }
 0x945   : > { %3448 = vadd.xlane.f32.xlu0 %v3447_v31 }
 0x946   : > { %v3450_v15 = vsel %vm492_vm0, %v3406_v13, 0.0  ;;  %v3407_v12 = vmul.f32 %v5537_v11, %v5537_v11 }
 0x947   : > { %3451 = vadd.xlane.f32.xlu1 %v3450_v15 }
 0x948   : > { %v3453_v48 = vsel %vm492_vm0, %v3407_v12, 0.0 }
 0x949   : > { %3454 = vadd.xlane.f32.xlu0 %v3453_v48 }
 0x974   : > { %v3416_v32 = vpop.xlane.xlu1 %3415 }
 0x975   : > { %v3458_v25 = vmul.f32 0.03125, %v3416_v32 }
 0x976   : > { %v3419_v37 = vpop.xlane.xlu0 %3418 }
 0x977   : > { %v3474_v5 = vadd.f32 1e-05, %v3458_v25  ;;  %v3459_v8 = vmul.f32 0.03125, %v3419_v37 }
 0x978   : > { %v3410_v57 = vpop.xlane.xlu1 %3409 }
 0x979   : > { %4267 = vrsqrt.f32 %v3474_v5  ;;  %v3475_v51 = vadd.f32 1e-05, %v3459_v8  ;;  %v3456_v10 = vmul.f32 0.03125, %v3410_v57 }
 0x97a   : > { %v3413_v58 = vpop.xlane.xlu0 %3412 }
 0x97b   : > { %4269 = vrsqrt.f32 %v3475_v51  ;;  %v3472_v54 = vadd.f32 1e-05, %v3456_v10  ;;  %v3457_v22 = vmul.f32 0.03125, %v3413_v58 }
 0x97d   : > { %4271 = vrsqrt.f32 %v3472_v54  ;;  %v3473_v49 = vadd.f32 1e-05, %v3457_v22 }
 0x97f   : > { %4273 = vrsqrt.f32 %v3473_v49 }
 0x983   : > { %v4268_v40 = vpop.eup %4267 }
 0x984   : > { %v3506_v63 = vmul.f32 %v4268_v40, %v5451_v16 }
 0x985   : > { %v4270_v17 = vpop.eup %4269 }
 0x986   : > { %v3529_v18 = vmul.f32 %v5549_v29, %v3506_v63  ;;  %v3507_v42 = vmul.f32 %v4270_v17, %v5454_v62 }
 0x987   : > { %v4272_v43 = vpop.eup %4271 }
 0x988   : > { %v3552_v16 = vadd.f32 %v5555_v38, %v3529_v18  ;;  %v3530_v0 = vmul.f32 %v5549_v29, %v3507_v42  ;;  %v3504_v59 = vmul.f32 %v4272_v43, %v5459_v14 }
 0x989   : > { %v4274_v9 = vpop.eup %4273 }
 0x98a   : > { %3568 = vst.msk [vmem:[%s5564_s28 + $0x10] sm:$0xff] %vm492_vm0, %v3552_v16  ;;  %v3553_v62 = vadd.f32 %v5555_v38, %v3530_v0  ;;  %v3527_v20 = vmul.f32 %v5549_v29, %v3504_v59  ;;  %v3505_v7 = vmul.f32 %v4274_v9, %v5465_v27 }
 0x98c   : > { %3569 = vst.msk [vmem:[%s5564_s28 + $0x18] sm:$0xff] %vm492_vm0, %v3553_v62  ;;  %v3550_v61 = vadd.f32 %v5555_v38, %v3527_v20  ;;  %v3528_v36 = vmul.f32 %v5549_v29, %v3505_v7 }
 0x98e   : > { %3566 = vst.msk [vmem:[%s5564_s28] sm:$0xff] %vm492_vm0, %v3550_v61  ;;  %v3551_v50 = vadd.f32 %v5555_v38, %v3528_v36 }
 0x990   : > { %3567 = vst.msk [vmem:[%s5564_s28 + $0x8] sm:$0xff] %vm492_vm0, %v3551_v50 }
 0x99f   : > { %v3428_v14 = vpop.xlane.xlu1 %3427 }
 0x9a0   : > { %v3462_v60 = vmul.f32 0.03125, %v3428_v14 }
 0x9a1   : > { %v3431_v35 = vpop.xlane.xlu0 %3430 }
 0x9a2   : > { %v3478_v39 = vadd.f32 1e-05, %v3462_v60  ;;  %v3463_v2 = vmul.f32 0.03125, %v3431_v35 }
 0x9a3   : > { %v3422_v56 = vpop.xlane.xlu1 %3421 }
 0x9a4   : > { %4275 = vrsqrt.f32 %v3478_v39  ;;  %v3479_v27 = vadd.f32 1e-05, %v3463_v2  ;;  %v3460_v26 = vmul.f32 0.03125, %v3422_v56 }
 0x9a5   : > { %v3425_v4 = vpop.xlane.xlu0 %3424 }
 0x9a6   : > { %4277 = vrsqrt.f32 %v3479_v27  ;;  %v3476_v47 = vadd.f32 1e-05, %v3460_v26  ;;  %v3461_v6 = vmul.f32 0.03125, %v3425_v4 }
 0x9a8   : > { %4279 = vrsqrt.f32 %v3476_v47  ;;  %v3477_v34 = vadd.f32 1e-05, %v3461_v6 }
 0x9aa   : > { %4281 = vrsqrt.f32 %v3477_v34 }
 0x9ae   : > { %v4276_v41 = vpop.eup %4275 }
 0x9af   : > { %v3510_v24 = vmul.f32 %v4276_v41, %v5475_v23  ;;  %v3440_v52 = vpop.xlane.xlu1 %3439 }
 0x9b0   : > { %v4278_v33 = vpop.eup %4277  ;;  %v3466_v21 = vmul.f32 0.03125, %v3440_v52 }
 0x9b1   : > { %v3533_v31 = vmul.f32 %v5549_v29, %v3510_v24  ;;  %v3511_v13 = vmul.f32 %v4278_v33, %v5478_v44  ;;  %v3443_v15 = vpop.xlane.xlu0 %3442 }
 0x9b2   : > { %v4280_v12 = vpop.eup %4279  ;;  %v3482_v48 = vadd.f32 1e-05, %v3466_v21  ;;  %v3467_v32 = vmul.f32 0.03125, %v3443_v15 }
 0x9b3   : > { %v3556_v25 = vadd.f32 %v5555_v38, %v3533_v31  ;;  %v3534_v37 = vmul.f32 %v5549_v29, %v3511_v13  ;;  %v3508_v5 = vmul.f32 %v4280_v12, %v5483_v30  ;;  %v3434_v23 = vpop.xlane.xlu1 %3433 }
 0x9b4   : > { %v4282_v8 = vpop.eup %4281  ;;  %4283 = vrsqrt.f32 %v3482_v48  ;;  %v3483_v57 = vadd.f32 1e-05, %v3467_v32  ;;  %v3464_v51 = vmul.f32 0.03125, %v3434_v23 }
 0x9b5   : > { %3572 = vst.msk [vmem:[%s5564_s28 + $0x30] sm:$0xff] %vm492_vm0, %v3556_v25  ;;  %v3557_v44 = vadd.f32 %v5555_v38, %v3534_v37  ;;  %v3531_v10 = vmul.f32 %v5549_v29, %v3508_v5  ;;  %v3509_v58 = vmul.f32 %v4282_v8, %v5489_v28  ;;  %v3437_v54 = vpop.xlane.xlu0 %3436 }
 0x9b6   : > { %4285 = vrsqrt.f32 %v3483_v57  ;;  %v3480_v22 = vadd.f32 1e-05, %v3464_v51  ;;  %v3465_v49 = vmul.f32 0.03125, %v3437_v54 }
 0x9b7   : > { %3573 = vst.msk [vmem:[%s5564_s28 + $0x38] sm:$0xff] %vm492_vm0, %v3557_v44  ;;  %v3554_v30 = vadd.f32 %v5555_v38, %v3531_v10  ;;  %v3532_v40 = vmul.f32 %v5549_v29, %v3509_v58 }
 0x9b8   : > { %4287 = vrsqrt.f32 %v3480_v22  ;;  %v3481_v63 = vadd.f32 1e-05, %v3465_v49 }
 0x9b9   : > { %3570 = vst.msk [vmem:[%s5564_s28 + $0x20] sm:$0xff] %vm492_vm0, %v3554_v30  ;;  %v3555_v17 = vadd.f32 %v5555_v38, %v3532_v40 }
 0x9ba   : > { %4289 = vrsqrt.f32 %v3481_v63 }
 0x9bb   : > { %3571 = vst.msk [vmem:[%s5564_s28 + $0x28] sm:$0xff] %vm492_vm0, %v3555_v17 }
 0x9be   : > { %v4284_v28 = vpop.eup %4283 }
 0x9bf   : > { %v3514_v18 = vmul.f32 %v4284_v28, %v5499_v19 }
 0x9c0   : > { %v4286_v42 = vpop.eup %4285 }
 0x9c1   : > { %v3537_v43 = vmul.f32 %v5549_v29, %v3514_v18  ;;  %v3515_v16 = vmul.f32 %v4286_v42, %v5502_v53 }
 0x9c2   : > { %v4288_v0 = vpop.eup %4287 }
 0x9c3   : > { %v3560_v59 = vadd.f32 %v5555_v38, %v3537_v43  ;;  %v3538_v9 = vmul.f32 %v5549_v29, %v3515_v16  ;;  %v3512_v62 = vmul.f32 %v4288_v0, %v5507_v55 }
 0x9c4   : > { %v4290_v20 = vpop.eup %4289 }
 0x9c5   : > { %3576 = vst.msk [vmem:[%s5564_s28 + $0x50] sm:$0xff] %vm492_vm0, %v3560_v59  ;;  %v3561_v7 = vadd.f32 %v5555_v38, %v3538_v9  ;;  %v3535_v19 = vmul.f32 %v5549_v29, %v3512_v62  ;;  %v3513_v61 = vmul.f32 %v4290_v20, %v5513_v1 }
 0x9c7   : > { %3577 = vst.msk [vmem:[%s5564_s28 + $0x58] sm:$0xff] %vm492_vm0, %v3561_v7  ;;  %v3558_v53 = vadd.f32 %v5555_v38, %v3535_v19  ;;  %v3536_v36 = vmul.f32 %v5549_v29, %v3513_v61 }
 0x9c9   : > { %3574 = vst.msk [vmem:[%s5564_s28 + $0x40] sm:$0xff] %vm492_vm0, %v3558_v53  ;;  %v3559_v50 = vadd.f32 %v5555_v38, %v3536_v36 }
 0x9cb   : > { %3575 = vst.msk [vmem:[%s5564_s28 + $0x48] sm:$0xff] %vm492_vm0, %v3559_v50 }
 0x9d0   : > { %v3446_v55 = vpop.xlane.xlu1 %3445 }
 0x9d1   : > { %v3468_v14 = vmul.f32 0.03125, %v3446_v55 }
 0x9d2   : > { %v3449_v60 = vpop.xlane.xlu0 %3448 }
 0x9d3   : > { %v3484_v35 = vadd.f32 1e-05, %v3468_v14  ;;  %v3469_v39 = vmul.f32 0.03125, %v3449_v60 }
 0x9d4   : > { %v3452_v2 = vpop.xlane.xlu1 %3451 }
 0x9d5   : > { %4291 = vrsqrt.f32 %v3484_v35  ;;  %v3485_v1 = vadd.f32 1e-05, %v3469_v39  ;;  %v3470_v56 = vmul.f32 0.03125, %v3452_v2 }
 0x9d6   : > { %v3455_v27 = vpop.xlane.xlu0 %3454 }
 0x9d7   : > { %4293 = vrsqrt.f32 %v3485_v1  ;;  %v3486_v26 = vadd.f32 1e-05, %v3470_v56  ;;  %v3471_v4 = vmul.f32 0.03125, %v3455_v27 }
 0x9d9   : > { %4295 = vrsqrt.f32 %v3486_v26  ;;  %v3487_v47 = vadd.f32 1e-05, %v3471_v4 }
 0x9db   : > { %4297 = vrsqrt.f32 %v3487_v47 }
 0x9df   : > { %v4292_v6 = vpop.eup %4291 }
 0x9e0   : > { %v3516_v34 = vmul.f32 %v4292_v6, %v5523_v46 }
 0x9e1   : > { %v4294_v41 = vpop.eup %4293 }
 0x9e2   : > { %v3539_v24 = vmul.f32 %v5549_v29, %v3516_v34  ;;  %v3517_v52 = vmul.f32 %v4294_v41, %v5526_v3 }
 0x9e3   : > { %v4296_v33 = vpop.eup %4295 }
 0x9e4   : > { %v3562_v21 = vadd.f32 %v5555_v38, %v3539_v24  ;;  %v3540_v31 = vmul.f32 %v5549_v29, %v3517_v52  ;;  %v3518_v13 = vmul.f32 %v4296_v33, %v5531_v45 }
 0x9e5   : > { %v4298_v15 = vpop.eup %4297 }
 0x9e6   : > { %3578 = vst.msk [vmem:[%s5564_s28 + $0x60] sm:$0xff] %vm492_vm0, %v3562_v21  ;;  %v3563_v12 = vadd.f32 %v5555_v38, %v3540_v31  ;;  %v3541_v46 = vmul.f32 %v5549_v29, %v3518_v13  ;;  %v3519_v48 = vmul.f32 %v4298_v15, %v5537_v11 }
 0x9e8   : > { %3579 = vst.msk [vmem:[%s5564_s28 + $0x68] sm:$0xff] %vm492_vm0, %v3563_v12  ;;  %v3564_v3 = vadd.f32 %v5555_v38, %v3541_v46  ;;  %v3542_v32 = vmul.f32 %v5549_v29, %v3519_v48 }
 0x9ea   : > { %3580 = vst.msk [vmem:[%s5564_s28 + $0x70] sm:$0xff] %vm492_vm0, %v3564_v3  ;;  %v3565_v25 = vadd.f32 %v5555_v38, %v3542_v32 }
 0x9ec   : > { %3581 = vst.msk [vmem:[%s5564_s28 + $0x78] sm:$0xff] %vm492_vm0, %v3565_v25 }
 0x9ed PF: > { %s23_s25 = sadd.s32 1, %s4321_s25  }
 0x9ee   : > { %p20_p4 = scmp.ge.s32.totalorder %s23_s25, 4  }
 0x9f0   :  { %22 = sbr.rel (!%p20_p4) target bundleno = 1 (0x1), region = 102 }

</bundles_post_ra>
